<compile_context>
chip_gen: v5e
topology: v5e:2x2
jax: 0.10.0
libtpu: 0.0.40
codegen_flags: <defaults>
</compile_context>

<pallas_src>
import math
import numpy as np
import jax
import jax.numpy as jnp
from jax.experimental import pallas as pl
from jax.experimental.pallas import tpu as pltpu


def _make_sdpa_kernel(B, Lq, Lk, D, H, lq_scale, emb_scale, inv_lq):
    """Whole-problem kernel: every operand fits in VMEM at these shapes."""

    def kernel(q_ref, k_ref, v_ref, w1_ref, b1_ref, w2t_ref, b2_ref,
               out_ref, attn_ref):
        q = q_ref[...]                       # (B, Lq, D)  bf16
        k = k_ref[...]                       # (B, Lk, D)  bf16
        v = v_ref[...]                       # (B, Lk, D)  bf16

        # ---- gating branch: g = fc2(tanh(fc1(v))) ---------------------------
        # fc1 over all B*Lk rows in one MXU call (bf16 x bf16 -> f32 acc).
        h = jnp.tanh(
            jnp.dot(v.reshape(B * Lk, D), w1_ref[...],
                    preferred_element_type=jnp.float32)
            + b1_ref[...])                                   # (B*Lk, H) f32
        h3 = h.reshape(B, Lk, H)                             # (B, Lk, H)
        # fc2 as a batched (M=1) contraction that lands g directly as
        # (B, 1, Lk): key axis on lanes, ready to broadcast over queries.
        w2t_b = jnp.broadcast_to(w2t_ref[...][None], (B, 1, H))
        g = jnp.einsum('bxh,bkh->bxk', w2t_b, h3,
                       preferred_element_type=jnp.float32) + b2_ref[...]

        # ---- scores = q @ k^T / sqrt(Lq) ------------------------------------
        scores = jnp.einsum('bqd,bkd->bqk', q, k,
                            preferred_element_type=jnp.float32) * lq_scale

        # softmax over the *query* axis (torch dim=1)
        m0 = jnp.max(scores, axis=1, keepdims=True)
        e0 = jnp.exp(scores - m0)
        s = e0 * pl.reciprocal(jnp.sum(e0, axis=1, keepdims=True), approx=True)
        mean_s = jnp.sum(s, axis=1, keepdims=True) * inv_lq   # (B, 1, Lk)

        # gated mix, scaled by 1/sqrt(embed_dim)
        attn_scores = (s * (1.0 - g) + mean_s * g) * emb_scale

        # softmax over the key axis; Dropout(p=0) is the identity
        m1 = jnp.max(attn_scores, axis=-1, keepdims=True)
        e1 = jnp.exp(attn_scores - m1)
        attn_w = e1 * pl.reciprocal(jnp.sum(e1, axis=-1, keepdims=True),
                                    approx=True)              # (B, Lq, Lk) f32

        out = jnp.einsum('bqk,bkd->bqd', attn_w.astype(v.dtype), v,
                         preferred_element_type=jnp.float32) \
            + q.astype(jnp.float32)

        out_ref[...] = out.astype(out_ref.dtype)
        # attn_weights last dim (Lk=8) is not lane-dense, but the module
        # returns it, so it is kept as a second output.
        attn_ref[...] = attn_w.astype(attn_ref.dtype)

    return kernel


def scaled_dot_product_attention(q, k, v, w1, b1, w2t, b2, embed_dim):
    B, Lq, D = q.shape
    _, Lk, _ = k.shape
    H = w1.shape[1]

    lq_scale = 1.0 / math.sqrt(float(Lq))           # torch: / sqrt(q.shape[1])
    emb_scale = 1.0 / math.sqrt(float(embed_dim))   # torch: / self.scale
    inv_lq = 1.0 / float(Lq)

    # bf16 storage for the matmul operands (halves the dominant HBM traffic,
    # mainly the 768x512 fc1 weight). Accumulation stays f32 in-kernel.
    qb = q.astype(jnp.bfloat16)
    kb = k.astype(jnp.bfloat16)
    vb = v.astype(jnp.bfloat16)
    w1b = w1.astype(jnp.bfloat16)
    b1f = b1.astype(jnp.float32)
    w2tf = w2t.astype(jnp.float32)
    b2f = b2.astype(jnp.float32)

    out_shapes = (
        jax.ShapeDtypeStruct((B, Lq, D), jnp.float32),    # attn_output
        jax.ShapeDtypeStruct((B, Lq, Lk), jnp.float32),   # attn_weights
    )

    vmem = pl.BlockSpec(memory_space=pltpu.MemorySpace.VMEM)
    return pl.pallas_call(
        _make_sdpa_kernel(B, Lq, Lk, D, H, lq_scale, emb_scale, inv_lq),
        out_shape=out_shapes,
        in_specs=[vmem] * 7,
        out_specs=(vmem, vmem),
    )(qb, kb, vb, w1b, b1f, w2tf, b2f)


def ref_forward(q, k, v, w1, b1, w2t, b2, embed_dim):
    """Pure-JAX f32 reference mirroring the PyTorch forward."""
    q = q.astype(jnp.float32)
    k = k.astype(jnp.float32)
    v = v.astype(jnp.float32)
    w1 = w1.astype(jnp.float32)
    h = jnp.tanh(jnp.einsum('bld,dh->blh', v, w1) + b1)
    g = jnp.einsum('blh,h->bl', h, w2t[0]) + b2[0, 0]              # (B, Lk)
    scores = jnp.einsum('bqd,bkd->bqk', q, k) / jnp.sqrt(
        jnp.float32(q.shape[1]))
    s = jax.nn.softmax(scores, axis=1)
    gg = g[:, None, :]
    attn_scores = (s * (1.0 - gg)
                   + jnp.mean(s, axis=1, keepdims=True) * gg) / jnp.sqrt(
                       jnp.float32(embed_dim))
    attn_w = jax.nn.softmax(attn_scores, axis=-1)
    out = jnp.einsum('bqk,bkd->bqd', attn_w, v) + q
    return out, attn_w


if __name__ == "__main__":
    B, L, D, H = 2, 8, 768, 512     # batch=2, seq=8, embed=768 (fc1 is 768->512)
    embed_dim = D

    key = jax.random.PRNGKey(0)
    kq, kk, kv, kw1, kb1, kw2, kb2 = jax.random.split(key, 7)

    # Inputs/weights stored in bf16 (same arrays go to kernel and reference;
    # the reference upcasts to f32 for its math).
    q = jax.random.normal(kq, (B, L, D), jnp.float32).astype(jnp.bfloat16)
    k = jax.random.normal(kk, (B, L, D), jnp.float32).astype(jnp.bfloat16)
    v = jax.random.normal(kv, (B, L, D), jnp.float32).astype(jnp.bfloat16)

    # Deterministic parameter init (PyTorch-style uniform(-1/sqrt(fan_in), ...)).
    bnd1 = 1.0 / math.sqrt(D)
    w1 = jax.random.uniform(kw1, (D, H), jnp.float32,
                            -bnd1, bnd1).astype(jnp.bfloat16)
    b1 = jax.random.uniform(kb1, (1, H), jnp.float32, -bnd1, bnd1)
    bnd2 = 1.0 / math.sqrt(H)
    w2t = jax.random.uniform(kw2, (1, H), jnp.float32, -bnd2, bnd2)   # fc2 W^T
    b2 = jax.random.uniform(kb2, (1, 1), jnp.float32, -bnd2, bnd2)
    # TODO(synk): fc3 = Linear(61, 80) exists in __init__ but is unused in forward().

    out, attn_w = scaled_dot_product_attention(q, k, v, w1, b1, w2t, b2,
                                               embed_dim)
    out = jax.block_until_ready(out)
    attn_w = jax.block_until_ready(attn_w)

    ref_out, ref_attn = ref_forward(q, k, v, w1, b1, w2t, b2, embed_dim)
    np.testing.assert_allclose(np.asarray(out), np.asarray(ref_out),
                               rtol=2e-2, atol=2e-2)
    np.testing.assert_allclose(np.asarray(attn_w), np.asarray(ref_attn),
                               rtol=2e-2, atol=2e-2)

    print("KERNEL_OK")
</pallas_src>

<mosaic_0001>
module attributes {stable_mosaic.version = 11 : i64} {
  func.func @kernel(%arg0: memref<2x8x768xbf16, #tpu.memory_space<vmem>>, %arg1: memref<2x8x768xbf16, #tpu.memory_space<vmem>>, %arg2: memref<2x8x768xbf16, #tpu.memory_space<vmem>>, %arg3: memref<768x512xbf16, #tpu.memory_space<vmem>>, %arg4: memref<1x512xf32, #tpu.memory_space<vmem>>, %arg5: memref<1x512xf32, #tpu.memory_space<vmem>>, %arg6: memref<1x1xf32, #tpu.memory_space<vmem>>, %arg7: memref<2x8x768xf32, #tpu.memory_space<vmem>>, %arg8: memref<2x8x8xf32, #tpu.memory_space<vmem>>) attributes {dimension_semantics = [], scalar_prefetch = 0 : i64, scratch_operands = 0 : i64, tpu.core_type = #tpu.core_type<tc>} {
    %c0 = arith.constant 0 : index
    %c0_0 = arith.constant 0 : index
    %c0_1 = arith.constant 0 : index
    %0 = vector.load %arg0[%c0, %c0_0, %c0_1] : memref<2x8x768xbf16, #tpu.memory_space<vmem>>, vector<2x8x768xbf16>
    %c0_2 = arith.constant 0 : index
    %c0_3 = arith.constant 0 : index
    %c0_4 = arith.constant 0 : index
    %1 = vector.load %arg1[%c0_2, %c0_3, %c0_4] : memref<2x8x768xbf16, #tpu.memory_space<vmem>>, vector<2x8x768xbf16>
    %c0_5 = arith.constant 0 : index
    %c0_6 = arith.constant 0 : index
    %c0_7 = arith.constant 0 : index
    %2 = vector.load %arg2[%c0_5, %c0_6, %c0_7] : memref<2x8x768xbf16, #tpu.memory_space<vmem>>, vector<2x8x768xbf16>
    %3 = vector.shape_cast %2 : vector<2x8x768xbf16> to vector<16x768xbf16>
    %c0_8 = arith.constant 0 : index
    %c0_9 = arith.constant 0 : index
    %4 = vector.load %arg3[%c0_8, %c0_9] : memref<768x512xbf16, #tpu.memory_space<vmem>>, vector<768x512xbf16>
    %cst = arith.constant dense<0.000000e+00> : vector<16x512xf32>
    %5 = tpu.matmul %3, %4, %cst {dimension_numbers = #tpu.dot_dimension_numbers<[1], [0], [0], [1], [0, 0, 1, 1], [], []>} : vector<16x768xbf16>, vector<768x512xbf16>, vector<16x512xf32> -> vector<16x512xf32>
    %c0_10 = arith.constant 0 : index
    %c0_11 = arith.constant 0 : index
    %6 = vector.load %arg4[%c0_10, %c0_11] : memref<1x512xf32, #tpu.memory_space<vmem>>, vector<1x512xf32>
    %7 = vector.broadcast %6 : vector<1x512xf32> to vector<16x512xf32>
    %8 = arith.addf %5, %7 : vector<16x512xf32>
    %9 = math.tanh %8 : vector<16x512xf32>
    %10 = vector.shape_cast %9 : vector<16x512xf32> to vector<2x8x512xf32>
    %c0_12 = arith.constant 0 : index
    %c0_13 = arith.constant 0 : index
    %11 = vector.load %arg5[%c0_12, %c0_13] : memref<1x512xf32, #tpu.memory_space<vmem>>, vector<1x512xf32>
    %12 = vector.shape_cast %11 : vector<1x512xf32> to vector<1x1x512xf32>
    %13 = vector.shape_cast %12 : vector<1x1x512xf32> to vector<1x1x512xf32>
    %14 = vector.broadcast %13 : vector<1x1x512xf32> to vector<2x1x512xf32>
    "tpu.trace_start"() <{level = 10 : i32, message = "bxh,bkh->bxk"}> : () -> ()
    %cst_14 = arith.constant dense<0.000000e+00> : vector<2x1x8xf32>
    %15 = tpu.matmul %14, %10, %cst_14 {dimension_numbers = #tpu.dot_dimension_numbers<[2], [2], [1], [1], [0, 0, 0, 1, 1, 1], [0], [0]>} : vector<2x1x512xf32>, vector<2x8x512xf32>, vector<2x1x8xf32> -> vector<2x1x8xf32>
    "tpu.trace_stop"() : () -> ()
    %c0_15 = arith.constant 0 : index
    %c0_16 = arith.constant 0 : index
    %16 = vector.load %arg6[%c0_15, %c0_16] : memref<1x1xf32, #tpu.memory_space<vmem>>, vector<1x1xf32>
    %17 = vector.shape_cast %16 : vector<1x1xf32> to vector<1x1x1xf32>
    %18 = vector.broadcast %17 : vector<1x1x1xf32> to vector<2x1x8xf32>
    %19 = arith.addf %15, %18 : vector<2x1x8xf32>
    "tpu.trace_start"() <{level = 10 : i32, message = "bqd,bkd->bqk"}> : () -> ()
    %cst_17 = arith.constant dense<0.000000e+00> : vector<2x8x8xf32>
    %20 = tpu.matmul %0, %1, %cst_17 {dimension_numbers = #tpu.dot_dimension_numbers<[2], [2], [1], [1], [0, 0, 0, 1, 1, 1], [0], [0]>} : vector<2x8x768xbf16>, vector<2x8x768xbf16>, vector<2x8x8xf32> -> vector<2x8x8xf32>
    "tpu.trace_stop"() : () -> ()
    %cst_18 = arith.constant 0.353553385 : f32
    %21 = vector.broadcast %cst_18 : f32 to vector<2x8x8xf32>
    %22 = arith.mulf %20, %21 : vector<2x8x8xf32>
    %cst_19 = arith.constant dense<0xFF800000> : vector<2x8xf32>
    %23 = vector.multi_reduction <maximumf>, %22, %cst_19 [1] : vector<2x8x8xf32> to vector<2x8xf32>
    %24 = vector.shape_cast %23 : vector<2x8xf32> to vector<2x1x8xf32>
    %25 = vector.broadcast %24 : vector<2x1x8xf32> to vector<2x8x8xf32>
    %26 = arith.subf %22, %25 : vector<2x8x8xf32>
    %27 = math.exp %26 : vector<2x8x8xf32>
    %cst_20 = arith.constant dense<0.000000e+00> : vector<2x8xf32>
    %28 = vector.multi_reduction <add>, %27, %cst_20 [1] : vector<2x8x8xf32> to vector<2x8xf32>
    %29 = vector.shape_cast %28 : vector<2x8xf32> to vector<2x1x8xf32>
    %30 = tpu.reciprocal %29 {approx = true} : vector<2x1x8xf32> -> vector<2x1x8xf32>
    %31 = vector.broadcast %30 : vector<2x1x8xf32> to vector<2x8x8xf32>
    %32 = arith.mulf %27, %31 : vector<2x8x8xf32>
    %cst_21 = arith.constant dense<0.000000e+00> : vector<2x8xf32>
    %33 = vector.multi_reduction <add>, %32, %cst_21 [1] : vector<2x8x8xf32> to vector<2x8xf32>
    %34 = vector.shape_cast %33 : vector<2x8xf32> to vector<2x1x8xf32>
    %cst_22 = arith.constant 1.250000e-01 : f32
    %35 = vector.broadcast %cst_22 : f32 to vector<2x1x8xf32>
    %36 = arith.mulf %34, %35 : vector<2x1x8xf32>
    %cst_23 = arith.constant 1.000000e+00 : f32
    %37 = vector.broadcast %cst_23 : f32 to vector<2x1x8xf32>
    %38 = arith.subf %37, %19 : vector<2x1x8xf32>
    %39 = vector.broadcast %38 : vector<2x1x8xf32> to vector<2x8x8xf32>
    %40 = arith.mulf %32, %39 : vector<2x8x8xf32>
    %41 = arith.mulf %36, %19 : vector<2x1x8xf32>
    %42 = vector.broadcast %41 : vector<2x1x8xf32> to vector<2x8x8xf32>
    %43 = arith.addf %40, %42 : vector<2x8x8xf32>
    %cst_24 = arith.constant 0.0360843912 : f32
    %44 = vector.broadcast %cst_24 : f32 to vector<2x8x8xf32>
    %45 = arith.mulf %43, %44 : vector<2x8x8xf32>
    %cst_25 = arith.constant dense<0xFF800000> : vector<2x8xf32>
    %46 = vector.multi_reduction <maximumf>, %45, %cst_25 [2] : vector<2x8x8xf32> to vector<2x8xf32>
    %47 = vector.shape_cast %46 : vector<2x8xf32> to vector<2x8x1xf32>
    %48 = vector.broadcast %47 : vector<2x8x1xf32> to vector<2x8x8xf32>
    %49 = arith.subf %45, %48 : vector<2x8x8xf32>
    %50 = math.exp %49 : vector<2x8x8xf32>
    %cst_26 = arith.constant dense<0.000000e+00> : vector<2x8xf32>
    %51 = vector.multi_reduction <add>, %50, %cst_26 [2] : vector<2x8x8xf32> to vector<2x8xf32>
    %52 = vector.shape_cast %51 : vector<2x8xf32> to vector<2x8x1xf32>
    %53 = tpu.reciprocal %52 {approx = true} : vector<2x8x1xf32> -> vector<2x8x1xf32>
    %54 = vector.broadcast %53 : vector<2x8x1xf32> to vector<2x8x8xf32>
    %55 = arith.mulf %50, %54 : vector<2x8x8xf32>
    %56 = arith.truncf %55 : vector<2x8x8xf32> to vector<2x8x8xbf16>
    "tpu.trace_start"() <{level = 10 : i32, message = "bqk,bkd->bqd"}> : () -> ()
    %cst_27 = arith.constant dense<0.000000e+00> : vector<2x8x768xf32>
    %57 = tpu.matmul %56, %2, %cst_27 {dimension_numbers = #tpu.dot_dimension_numbers<[2], [1], [1], [2], [0, 0, 0, 1, 1, 2], [0], [0]>} : vector<2x8x8xbf16>, vector<2x8x768xbf16>, vector<2x8x768xf32> -> vector<2x8x768xf32>
    "tpu.trace_stop"() : () -> ()
    %58 = arith.extf %0 : vector<2x8x768xbf16> to vector<2x8x768xf32>
    %59 = arith.addf %57, %58 : vector<2x8x768xf32>
    %c0_28 = arith.constant 0 : index
    %c0_29 = arith.constant 0 : index
    %c0_30 = arith.constant 0 : index
    %60 = vector.load %arg7[%c0_28, %c0_29, %c0_30] : memref<2x8x768xf32, #tpu.memory_space<vmem>>, vector<2x8x768xf32>
    tpu.vector_store %arg7[%c0_28, %c0_29, %c0_30], %59 {strides = array<i32>} : memref<2x8x768xf32, #tpu.memory_space<vmem>>, vector<2x8x768xf32>,
    %c0_31 = arith.constant 0 : index
    %c0_32 = arith.constant 0 : index
    %c0_33 = arith.constant 0 : index
    %61 = vector.load %arg8[%c0_31, %c0_32, %c0_33] : memref<2x8x8xf32, #tpu.memory_space<vmem>>, vector<2x8x8xf32>
    tpu.vector_store %arg8[%c0_31, %c0_32, %c0_33], %55 {strides = array<i32>} : memref<2x8x8xf32, #tpu.memory_space<vmem>>, vector<2x8x8xf32>,
    return
  }
}

</mosaic_0001>

<bundles_post_ra>
// kernel: tpu_custom_call.1
= control target key start
LH: loop header
LB: loop body
LE: loop exit
PB: predicated region body
PF: predicated region fallthrough
CT: control target
= control target key end

     0   :  { %s3934_s0 = inlined_call_operand.hbm [shape: bf16[2,8,768], index: 0, kind: input, shape index: {}]   ;;  %s3935_s1 = inlined_call_operand.hbm [shape: bf16[2,8,768], index: 1, kind: input, shape index: {}]   ;;  %s3936_s2 = inlined_call_operand.hbm [shape: bf16[2,8,768], index: 2, kind: input, shape index: {}]   ;;  %s3937_s3 = inlined_call_operand.hbm [shape: bf16[768,512], index: 3, kind: input, shape index: {}]   ;;  %s3938_s4 = inlined_call_operand.vmem [shape: f32[1,512], index: 4, kind: input, shape index: {}]   ;;  %s3939_s5 = inlined_call_operand.hbm [shape: f32[1,512], index: 5, kind: input, shape index: {}]   ;;  %s3940_s6 = inlined_call_operand.<no memory space> [shape: f32[1,1], index: 6, kind: input, shape index: {}]   ;;  %s3941_s7 = inlined_call_operand.hbm [shape: f32[2,8,768], index: 7, kind: output, shape index: {0}]   ;;  %s3942_s8 = inlined_call_operand.hbm [shape: f32[2,8,8], index: 8, kind: output, shape index: {1}]  }
   0x1   :  { %v14_v0 = vstv %s3940_s6 }
   0x2   :  { %15 = vst [vmem:[#allocation2] sm:$0x1] %v14_v0 }
   0x3   :  { %16 = vsyncpa [#allocation4], 0 }
   0x4   :  { %17 = vsyncpa [#allocation7], 0 }
   0x5   :  { %18 = vsyncpa [#allocation10], 0 }
   0x6   :  { %19 = vsyncpa [#allocation5], 0 }
   0x7   :  { %20 = vsyncpa [#allocation14], 0  ;;  %s38_s9 = sshll.u32 %s3935_s1, 4  ;;  %s3650_s10 = smov [#allocation6]   ;;  %s39_s9 = int_to_ptr.hbm [resolvable:$true] %s38_s9 }
   0x8   :  { %s40_s11 = sshll.u32 %s3650_s10, 4  ;;  %s64_s14 = sshll.u32 %s3937_s3, 4  ;;  %s41_s11 = int_to_ptr.vmem [resolvable:$true] %s40_s11  ;;  %s65_s14 = int_to_ptr.hbm [resolvable:$true] %s64_s14 }
   0x9   :  { %s3651_s15 = smov 384   ;;  %s3652_s6 = smov 24  }
   0xa   :  { %46 = dma.hbm_to_vmem [thread:$0]  %s39_s9, 768, %s41_s11, [#allocation7], %s3651_s15, %s3651_s15, %s3652_s6  }
   0xb   :  { %s3653_s16 = smov [#allocation9]   ;;  %s3654_s18 = smov 256  }
   0xc   :  { %s66_s17 = sshll.u32 %s3653_s16, 4  ;;  %s3655_s19 = smov 16   ;;  %s67_s17 = int_to_ptr.vmem [resolvable:$true] %s66_s17 }
   0xd   :  { %72 = dma.hbm_to_vmem [thread:$0]  %s65_s14, 24576, %s67_s17, [#allocation10], %s3654_s18, %s3654_s18, %s3655_s19  }
   0xe   :  { %s25_s21 = sshll.u32 %s3934_s0, 4  ;;  %s3656_s22 = smov [#allocation3]   ;;  %s26_s21 = int_to_ptr.hbm [resolvable:$true] %s25_s21 }
   0xf   :  { %s27_s23 = sshll.u32 %s3656_s22, 4  ;;  %s51_s25 = sshll.u32 %s3936_s2, 4  ;;  %s28_s23 = int_to_ptr.vmem [resolvable:$true] %s27_s23  ;;  %s52_s25 = int_to_ptr.hbm [resolvable:$true] %s51_s25 }
  0x10   :  { %33 = dma.hbm_to_vmem [thread:$0]  %s26_s21, 768, %s28_s23, [#allocation4], %s3651_s15, %s3651_s15, %s3652_s6  }
  0x11   :  { %s3657_s26 = smov [#allocation8]   ;;  %s80_s30 = sshll.u32 %s3939_s5, 4  ;;  %s81_s30 = int_to_ptr.hbm [resolvable:$true] %s80_s30 }
  0x12   :  { %s53_s27 = sshll.u32 %s3657_s26, 4  ;;  %s3658_s0 = smov [#allocation11]   ;;  %s54_s27 = int_to_ptr.vmem [resolvable:$true] %s53_s27 }
  0x13   :  { %59 = dma.hbm_to_vmem [thread:$0]  %s52_s25, 768, %s54_s27, [#allocation7], %s3651_s15, %s3651_s15, %s3652_s6  }
  0x14   :  { %s82_s9 = sshll.u32 %s3658_s0, 4  ;;  %s83_s9 = int_to_ptr.vmem [resolvable:$true] %s82_s9 }
  0x15   :  { %85 = dma.hbm_to_vmem [thread:$0]  %s81_s30, 64, %s83_s9, [#allocation10]  }
  0x16   :  { %3640 = dma.done.wait [#allocation4], 768  }
  0x17   :  { %3641 = vsyncadd [#allocation4], 4294966528 }
  0x18   :  { %3642 = dma.done.wait [#allocation7], 1536  }
  0x19   :  { %3643 = vsyncadd [#allocation7], 4294965760 }
  0x1a   :  { %3644 = dma.done.wait [#allocation10], 24640  }
  0x1b   :  { %3645 = vsyncadd [#allocation10], 4294942656  ;;  %v2565_v1 = vld [vmem:[#allocation9 + $0xe0] sm:$0xf]  ;;  %v3261_v2 = vld [vmem:[#allocation9 + $0xec] sm:$0xf0] }
  0x1c   :  { %v2693_v3 = vld [vmem:[#allocation9 + $0x1e0] sm:$0xf]  ;;  %v2566_v4 = vor.u32 %v3261_v2, %v2565_v1  ;;  %v3293_v5 = vld [vmem:[#allocation9 + $0x1ec] sm:$0xf0]  ;;  %vm2082_vm0 = vcmask 64512   ;;  %vm2196_vm1 = vcmask 1043456  }
  0x1d   :  { %v2821_v6 = vld [vmem:[#allocation9 + $0x2e0] sm:$0xf]  ;;  %v3325_v7 = vld [vmem:[#allocation9 + $0x2ec] sm:$0xf0]  ;;  %v2694_v8 = vor.u32 %v3293_v5, %v2693_v3  ;;  %s2431_s13 = sshll.u32 %s3942_s8, 4  ;;  %s3661_s14 = smov 128   ;;  %s2432_s13 = int_to_ptr.hbm [resolvable:$true] %s2431_s13 }
  0x1e   :  { %v2822_v9 = vor.u32 %v3325_v7, %v2821_v6  ;;  %v2949_v10 = vld [vmem:[#allocation9 + $0x3e0] sm:$0xf]  ;;  %v3357_v11 = vld [vmem:[#allocation9 + $0x3ec] sm:$0xf0]  ;;  %1319 = vmatpush.bf16.msra.mxu0 %v2566_v4  ;;  %s3662_s15 = smov 8   ;;  %s3663_s8 = smov [#allocation12]  }
  0x1f   :  { %v2549_v12 = vld [vmem:[#allocation9 + $0xc0] sm:$0xf]  ;;  %v2950_v13 = vor.u32 %v3357_v11, %v2949_v10  ;;  %v3257_v14 = vld [vmem:[#allocation9 + $0xcc] sm:$0xf0]  ;;  %1333 = vmatpush.bf16.msra.mxu1 %v2694_v8  ;;  %s2416_s6 = sshll.u32 %s3663_s8, 4  ;;  %s2418_s18 = sshll.u32 %s3941_s7, 4  ;;  %s2417_s6 = int_to_ptr.vmem [resolvable:$true] %s2416_s6  ;;  %s2419_s18 = int_to_ptr.hbm [resolvable:$true] %s2418_s18 }
  0x20   :  { %v2677_v15 = vld [vmem:[#allocation9 + $0x1c0] sm:$0xf]  ;;  %v3289_v16 = vld [vmem:[#allocation9 + $0x1cc] sm:$0xf0]  ;;  %1347 = vmatpush.bf16.msra.mxu2 %v2822_v9  ;;  %v2550_v17 = vor.u32 %v3257_v14, %v2549_v12  ;;  %s3664_s19 = smov 768   ;;  %s3665_s20 = smov 48  }
  0x21   :  { %v2678_v18 = vor.u32 %v3289_v16, %v2677_v15  ;;  %v2805_v19 = vld [vmem:[#allocation9 + $0x2c0] sm:$0xf]  ;;  %v3321_v20 = vld [vmem:[#allocation9 + $0x2cc] sm:$0xf0]  ;;  %1361 = vmatpush.bf16.msra.mxu3 %v2950_v13 }
  0x22   :  { %v2933_v21 = vld [vmem:[#allocation9 + $0x3c0] sm:$0xf]  ;;  %v2806_v22 = vor.u32 %v3321_v20, %v2805_v19  ;;  %v3353_v23 = vld [vmem:[#allocation9 + $0x3cc] sm:$0xf0]  ;;  %1320 = vmatpush.bf16.msra.mxu0 %v2550_v17 }
  0x23   :  { %v2533_v24 = vld [vmem:[#allocation9 + $0xa0] sm:$0xf]  ;;  %v3253_v25 = vld [vmem:[#allocation9 + $0xac] sm:$0xf0]  ;;  %v2934_v26 = vor.u32 %v3353_v23, %v2933_v21  ;;  %1334 = vmatpush.bf16.msra.mxu1 %v2678_v18 }
  0x24   :  { %v2661_v27 = vld [vmem:[#allocation9 + $0x1a0] sm:$0xf]  ;;  %v3285_v28 = vld [vmem:[#allocation9 + $0x1ac] sm:$0xf0]  ;;  %v2534_v30 = vor.u32 %v3253_v25, %v2533_v24  ;;  %1348 = vmatpush.bf16.msra.mxu2 %v2806_v22 }
  0x25   :  { %v2789_v29 = vld [vmem:[#allocation9 + $0x2a0] sm:$0xf]  ;;  %v3317_v31 = vld [vmem:[#allocation9 + $0x2ac] sm:$0xf0]  ;;  %v2662_v34 = vor.u32 %v3285_v28, %v2661_v27  ;;  %1362 = vmatpush.bf16.msra.mxu3 %v2934_v26 }
  0x26   :  { %v2917_v32 = vld [vmem:[#allocation9 + $0x3a0] sm:$0xf]  ;;  %v3349_v33 = vld [vmem:[#allocation9 + $0x3ac] sm:$0xf0]  ;;  %v2790_v35 = vor.u32 %v3317_v31, %v2789_v29  ;;  %1321 = vmatpush.bf16.msra.mxu0 %v2534_v30 }
  0x27   :  { %v2517_v36 = vld [vmem:[#allocation9 + $0x80] sm:$0xf]  ;;  %v3249_v37 = vld [vmem:[#allocation9 + $0x8c] sm:$0xf0]  ;;  %v2918_v39 = vor.u32 %v3349_v33, %v2917_v32  ;;  %1335 = vmatpush.bf16.msra.mxu1 %v2662_v34  ;;  %v3259_v34 = vld [vmem:[#allocation9 + $0xe4] sm:$0xf] }
  0x28   :  { %v2645_v38 = vld [vmem:[#allocation9 + $0x180] sm:$0xf]  ;;  %v3281_v40 = vld [vmem:[#allocation9 + $0x18c] sm:$0xf0]  ;;  %v2518_v45 = vor.u32 %v3249_v37, %v2517_v36  ;;  %1349 = vmatpush.bf16.msra.mxu2 %v2790_v35  ;;  %v2567_v35 = vld [vmem:[#allocation9 + $0xf0] sm:$0xf0] }
  0x29   :  { %v2773_v41 = vld [vmem:[#allocation9 + $0x280] sm:$0xf]  ;;  %v3313_v42 = vld [vmem:[#allocation9 + $0x28c] sm:$0xf0]  ;;  %v2646_v46 = vor.u32 %v3281_v40, %v2645_v38  ;;  %1363 = vmatpush.bf16.msra.mxu3 %v2918_v39  ;;  %v3291_v38 = vld [vmem:[#allocation9 + $0x1e4] sm:$0xf] }
  0x2a   :  { %v2901_v43 = vld [vmem:[#allocation9 + $0x380] sm:$0xf]  ;;  %v3345_v44 = vld [vmem:[#allocation9 + $0x38c] sm:$0xf0]  ;;  %v2774_v47 = vor.u32 %v3313_v42, %v2773_v41  ;;  %1322 = vmatpush.bf16.msra.mxu0 %v2518_v45  ;;  %v2695_v39 = vld [vmem:[#allocation9 + $0x1f0] sm:$0xf0]  ;;  %v2570_v45 = vor.u32 %v3259_v34, %v2567_v35 }
  0x2b   :  { %v2501_v48 = vld [vmem:[#allocation9 + $0x60] sm:$0xf]  ;;  %v3245_v49 = vld [vmem:[#allocation9 + $0x6c] sm:$0xf0]  ;;  %v2902_v51 = vor.u32 %v3345_v44, %v2901_v43  ;;  %1336 = vmatpush.bf16.msra.mxu1 %v2646_v46 }
  0x2c   :  { %v2629_v50 = vld [vmem:[#allocation9 + $0x160] sm:$0xf]  ;;  %v3277_v52 = vld [vmem:[#allocation9 + $0x16c] sm:$0xf0]  ;;  %v2502_v57 = vor.u32 %v3245_v49, %v2501_v48  ;;  %1350 = vmatpush.bf16.msra.mxu2 %v2774_v47  ;;  %v2698_v48 = vor.u32 %v3291_v38, %v2695_v39  ;;  %v3255_v49 = vld [vmem:[#allocation9 + $0xc4] sm:$0xf] }
  0x2d   :  { %v2757_v53 = vld [vmem:[#allocation9 + $0x260] sm:$0xf]  ;;  %v3309_v54 = vld [vmem:[#allocation9 + $0x26c] sm:$0xf0]  ;;  %v2630_v58 = vor.u32 %v3277_v52, %v2629_v50  ;;  %1364 = vmatpush.bf16.msra.mxu3 %v2902_v51  ;;  %v2551_v50 = vld [vmem:[#allocation9 + $0xd0] sm:$0xf0] }
  0x2e   :  { %v2885_v55 = vld [vmem:[#allocation9 + $0x360] sm:$0xf]  ;;  %v3341_v56 = vld [vmem:[#allocation9 + $0x36c] sm:$0xf0]  ;;  %v2758_v59 = vor.u32 %v3309_v54, %v2757_v53  ;;  %1323 = vmatpush.bf16.msra.mxu0 %v2502_v57  ;;  %v3287_v51 = vld [vmem:[#allocation9 + $0x1c4] sm:$0xf] }
  0x2f   :  { %v2485_v60 = vld [vmem:[#allocation9 + $0x40] sm:$0xf]  ;;  %v3241_v61 = vld [vmem:[#allocation9 + $0x4c] sm:$0xf0]  ;;  %v2886_v63 = vor.u32 %v3341_v56, %v2885_v55  ;;  %1337 = vmatpush.bf16.msra.mxu1 %v2630_v58  ;;  %v2679_v53 = vld [vmem:[#allocation9 + $0x1d0] sm:$0xf0] }
  0x30   :  { %v2613_v62 = vld [vmem:[#allocation9 + $0x140] sm:$0xf]  ;;  %v3273_v0 = vld [vmem:[#allocation9 + $0x14c] sm:$0xf0]  ;;  %v2486_v5 = vor.u32 %v3241_v61, %v2485_v60  ;;  %1351 = vmatpush.bf16.msra.mxu2 %v2758_v59  ;;  %v124_v55 = vld [vmem:[#allocation8 + $0x18] sm:$0xff] }
  0x31   :  { %v2741_v1 = vld [vmem:[#allocation9 + $0x240] sm:$0xf]  ;;  %v3305_v2 = vld [vmem:[#allocation9 + $0x24c] sm:$0xf0]  ;;  %v2614_v6 = vor.u32 %v3273_v0, %v2613_v62  ;;  %1365 = vmatpush.bf16.msra.mxu3 %v2886_v63  ;;  %v3731_v59 = vunpack.c.l.b16 %v124_v55  ;;  %v3735_v61 = vunpack.c.h.b16 %v124_v55  ;;  %v2554_v63 = vor.u32 %v3255_v49, %v2551_v50  ;;  %v2503_v38 = vld [vmem:[#allocation9 + $0x70] sm:$0xf0] }
  0x32   :  { %v2869_v3 = vld [vmem:[#allocation9 + $0x340] sm:$0xf]  ;;  %v3337_v4 = vld [vmem:[#allocation9 + $0x34c] sm:$0xf0]  ;;  %v2742_v7 = vor.u32 %v3305_v2, %v2741_v1  ;;  %1324 = vmatpush.bf16.msra.mxu0 %v2486_v5  ;;  %v3251_v2 = vld [vmem:[#allocation9 + $0xa4] sm:$0xf] }
  0x33   :  { %v2469_v8 = vld [vmem:[#allocation9 + $0x20] sm:$0xf]  ;;  %v3237_v9 = vld [vmem:[#allocation9 + $0x2c] sm:$0xf0]  ;;  %v2870_v11 = vor.u32 %v3337_v4, %v2869_v3  ;;  %1338 = vmatpush.bf16.msra.mxu1 %v2614_v6  ;;  %v2682_v3 = vor.u32 %v3287_v51, %v2679_v53  ;;  %v2535_v4 = vld [vmem:[#allocation9 + $0xb0] sm:$0xf0] }
  0x34   :  { %v2597_v10 = vld [vmem:[#allocation9 + $0x120] sm:$0xf]  ;;  %v3269_v12 = vld [vmem:[#allocation9 + $0x12c] sm:$0xf0]  ;;  %v2470_v17 = vor.u32 %v3237_v9, %v2469_v8  ;;  %1352 = vmatpush.bf16.msra.mxu2 %v2742_v7  ;;  %v3283_v5 = vld [vmem:[#allocation9 + $0x1a4] sm:$0xf] }
  0x35   :  { %v2725_v13 = vld [vmem:[#allocation9 + $0x220] sm:$0xf]  ;;  %v3301_v14 = vld [vmem:[#allocation9 + $0x22c] sm:$0xf0]  ;;  %v2598_v20 = vor.u32 %v3269_v12, %v2597_v10  ;;  %1366 = vmatpush.bf16.msra.mxu3 %v2870_v11  ;;  %v2663_v6 = vld [vmem:[#allocation9 + $0x1b0] sm:$0xf0] }
  0x36   :  { %v2853_v15 = vld [vmem:[#allocation9 + $0x320] sm:$0xf]  ;;  %v3333_v16 = vld [vmem:[#allocation9 + $0x32c] sm:$0xf0]  ;;  %v2726_v21 = vor.u32 %v3301_v14, %v2725_v13  ;;  %1325 = vmatpush.bf16.msra.mxu0 %v2470_v17  ;;  %v2538_v13 = vor.u32 %v3251_v2, %v2535_v4  ;;  %v2666_v14 = vor.u32 %v3283_v5, %v2663_v6  ;;  %v3275_v39 = vld [vmem:[#allocation9 + $0x164] sm:$0xf] }
  0x37   :  { %v2453_v18 = vld [vmem:[#allocation9] sm:$0xf]  ;;  %v3233_v19 = vld [vmem:[#allocation9 + $0xc] sm:$0xf0]  ;;  %v2854_v25 = vor.u32 %v3333_v16, %v2853_v15  ;;  %1339 = vmatpush.bf16.msra.mxu1 %v2598_v20  ;;  %v122_v16 = vld [vmem:[#allocation8 + $0x8] sm:$0xff] }
  0x38   :  { %v2581_v22 = vld [vmem:[#allocation9 + $0x100] sm:$0xf]  ;;  %v3265_v23 = vld [vmem:[#allocation9 + $0x10c] sm:$0xf0]  ;;  %v2454_v32 = vor.u32 %v3233_v19, %v2453_v18  ;;  %1353 = vmatpush.bf16.msra.mxu2 %v2726_v21  ;;  %v3247_v19 = vld [vmem:[#allocation9 + $0x84] sm:$0xf]  ;;  %v3747_v21 = vunpack.c.l.b16 %v122_v16 }
  0x39   :  { %v2709_v24 = vld [vmem:[#allocation9 + $0x200] sm:$0xf]  ;;  %v3297_v26 = vld [vmem:[#allocation9 + $0x20c] sm:$0xf0]  ;;  %v2582_v36 = vor.u32 %v3265_v23, %v2581_v22  ;;  %1367 = vmatpush.bf16.msra.mxu3 %v2854_v25  ;;  %v2519_v20 = vld [vmem:[#allocation9 + $0x90] sm:$0xf0]  ;;  %v3751_v23 = vunpack.c.h.b16 %v122_v16 }
  0x3a   :  { %v2837_v27 = vld [vmem:[#allocation9 + $0x300] sm:$0xf]  ;;  %v3329_v28 = vld [vmem:[#allocation9 + $0x30c] sm:$0xf0]  ;;  %v2710_v37 = vor.u32 %v3297_v26, %v2709_v24  ;;  %1326 = vmatpush.bf16.msra.mxu0 %v2454_v32  ;;  %v3279_v25 = vld [vmem:[#allocation9 + $0x184] sm:$0xf] }
  0x3b   :  { %v3077_v29 = vld [vmem:[#allocation9 + $0x4e0] sm:$0xf]  ;;  %v3389_v30 = vld [vmem:[#allocation9 + $0x4ec] sm:$0xf0]  ;;  %v2838_v40 = vor.u32 %v3329_v28, %v2837_v27  ;;  %1340 = vmatpush.bf16.msra.mxu1 %v2582_v36  ;;  %v2647_v26 = vld [vmem:[#allocation9 + $0x190] sm:$0xf0] }
  0x3c   :  { %v3205_v31 = vld [vmem:[#allocation9 + $0x5e0] sm:$0xf]  ;;  %v3421_v33 = vld [vmem:[#allocation9 + $0x5ec] sm:$0xf0]  ;;  %v3078_v41 = vor.u32 %v3389_v30, %v3077_v29  ;;  %1354 = vmatpush.bf16.msra.mxu2 %v2710_v37  ;;  %v2650_v35 = vor.u32 %v3279_v25, %v2647_v26  ;;  %v3243_v37 = vld [vmem:[#allocation9 + $0x64] sm:$0xf] }
  0x3d   :  { %v3061_v42 = vld [vmem:[#allocation9 + $0x4c0] sm:$0xf]  ;;  %v3385_v43 = vld [vmem:[#allocation9 + $0x4cc] sm:$0xf0]  ;;  %v3206_v44 = vor.u32 %v3421_v33, %v3205_v31  ;;  %1368 = vmatpush.bf16.msra.mxu3 %v2838_v40  ;;  %v2522_v31 = vor.u32 %v3247_v19, %v2519_v20  ;;  %v2631_v40 = vld [vmem:[#allocation9 + $0x170] sm:$0xf0] }
  0x3e   :  { %v3189_v46 = vld [vmem:[#allocation9 + $0x5c0] sm:$0xf]  ;;  %v3417_v47 = vld [vmem:[#allocation9 + $0x5cc] sm:$0xf0]  ;;  %v3062_v52 = vor.u32 %v3385_v43, %v3061_v42  ;;  %1375 = vmatpush.bf16.msrb.mxu0 %v3078_v41  ;;  %v2506_v43 = vor.u32 %v3243_v37, %v2503_v38  ;;  %v3239_v49 = vld [vmem:[#allocation9 + $0x44] sm:$0xf] }
  0x3f   :  { %v121_v54 = vld [vmem:[#allocation8] sm:$0xff]  ;;  %v3045_v56 = vld [vmem:[#allocation9 + $0x4a0] sm:$0xf]  ;;  %1389 = vmatpush.bf16.msrb.mxu1 %v3206_v44  ;;  %v3190_v62 = vor.u32 %v3417_v47, %v3189_v46  ;;  %v2634_v47 = vor.u32 %v3275_v39, %v2631_v40  ;;  %v3271_v51 = vld [vmem:[#allocation9 + $0x144] sm:$0xf] }
  0x40   :  { %v3381_v57 = vld [vmem:[#allocation9 + $0x4ac] sm:$0xf0]  ;;  %v3729_v58 = vunpack.c.l.b16 %v121_v54  ;;  %v3733_v60 = vunpack.c.h.b16 %v121_v54  ;;  %1403 = vmatpush.bf16.msrb.mxu2 %v2570_v45  ;;  %v3173_v0 = vld [vmem:[#allocation9 + $0x5a0] sm:$0xf]  ;;  %v2487_v50 = vld [vmem:[#allocation9 + $0x50] sm:$0xf0] }
  0x41   :  { %v3413_v1 = vld [vmem:[#allocation9 + $0x5ac] sm:$0xf0]  ;;  %1417 = vmatpush.bf16.msrb.mxu3 %v2698_v48  ;;  %v3046_v9 = vor.u32 %v3381_v57, %v3045_v56  ;;  %v3029_v10 = vld [vmem:[#allocation9 + $0x480] sm:$0xf]  ;;  %v2490_v55 = vor.u32 %v3239_v49, %v2487_v50  ;;  %v2471_v2 = vld [vmem:[#allocation9 + $0x30] sm:$0xf0] }
  0x42   :  { %v3739_v7 = vpack.c.b16 %v3731_v59, %v3729_v58  ;;  %v3743_v8 = vpack.c.b16 %v3735_v61, %v3733_v60  ;;  %1376 = vmatpush.bf16.msrb.mxu0 %v3062_v52  ;;  %v3377_v11 = vld [vmem:[#allocation9 + $0x48c] sm:$0xf0]  ;;  %v3174_v12 = vor.u32 %v3413_v1, %v3173_v0  ;;  %v3157_v15 = vld [vmem:[#allocation9 + $0x580] sm:$0xf]  ;;  %v2615_v52 = vld [vmem:[#allocation9 + $0x150] sm:$0xf0] }
  0x43   :  { %1390 = vmatpush.bf16.msrb.mxu1 %v3190_v62  ;;  %v125_v17 = vld [vmem:[#allocation8 + $0x20] sm:$0xff]  ;;  %v3030_v27 = vor.u32 %v3377_v11, %v3029_v10  ;;  %v3013_v32 = vld [vmem:[#allocation9 + $0x460] sm:$0xf]  ;;  %v3235_v1 = vld [vmem:[#allocation9 + $0x24] sm:$0xf] }
  0x44   :  { %1341 = vmatmul.bf16.vlgmr.msra.gmra.mxu1 %v3743_v8  ;;  %1404 = vmatpush.bf16.msrb.mxu2 %v2554_v63  ;;  %v3409_v18 = vld [vmem:[#allocation9 + $0x58c] sm:$0xf0]  ;;  %v3749_v22 = vunpack.c.l.b16 %v125_v17  ;;  %v3753_v24 = vunpack.c.h.b16 %v125_v17  ;;  %v3141_v34 = vld [vmem:[#allocation9 + $0x560] sm:$0xf]  ;;  %v2618_v63 = vor.u32 %v3271_v51, %v2615_v52  ;;  %v2599_v4 = vld [vmem:[#allocation9 + $0x130] sm:$0xf0] }
  0x45   :  { %1418 = vmatpush.bf16.msrb.mxu3 %v2682_v3  ;;  %1327 = vmatmul.bf16.vlgmr.msra.gmra.mxu0 %v3739_v7  ;;  %v3158_v30 = vor.u32 %v3409_v18, %v3157_v15  ;;  %v3373_v33 = vld [vmem:[#allocation9 + $0x46c] sm:$0xf0]  ;;  %v2997_v44 = vld [vmem:[#allocation9 + $0x440] sm:$0xf]  ;;  %v3267_v3 = vld [vmem:[#allocation9 + $0x124] sm:$0xf] }
  0x46   :  { %1377 = vmatpush.bf16.msrb.mxu0 %v3046_v9  ;;  %v3757_v28 = vpack.c.b16 %v3749_v22, %v3747_v21  ;;  %v3761_v29 = vpack.c.b16 %v3753_v24, %v3751_v23  ;;  %v3405_v36 = vld [vmem:[#allocation9 + $0x56c] sm:$0xf0]  ;;  %v3014_v41 = vor.u32 %v3373_v33, %v3013_v32  ;;  %v3125_v46 = vld [vmem:[#allocation9 + $0x540] sm:$0xf]  ;;  %v126_v16 = vld [vmem:[#allocation8 + $0x28] sm:$0xff]  ;;  %v2602_v17 = vor.u32 %v3267_v3, %v2599_v4 }
  0x47   :  { %1391 = vmatpush.bf16.msrb.mxu1 %v3174_v12  ;;  %v3142_v42 = vor.u32 %v3405_v36, %v3141_v34  ;;  %v3369_v45 = vld [vmem:[#allocation9 + $0x44c] sm:$0xf0]  ;;  %v2981_v56 = vld [vmem:[#allocation9 + $0x420] sm:$0xf]  ;;  %v2455_v18 = vld [vmem:[#allocation9 + $0x10] sm:$0xf0] }
  0x48   :  { %1405 = vmatpush.bf16.msrb.mxu2 %v2538_v13  ;;  %1369 = vmatmul.bf16.vlgmr.msra.gmra.mxu3 %v3761_v29  ;;  %v3401_v48 = vld [vmem:[#allocation9 + $0x54c] sm:$0xf0]  ;;  %v2998_v53 = vor.u32 %v3369_v45, %v2997_v44  ;;  %v3109_v62 = vld [vmem:[#allocation9 + $0x520] sm:$0xf]  ;;  %v2474_v13 = vor.u32 %v3235_v1, %v2471_v2  ;;  %v3263_v19 = vld [vmem:[#allocation9 + $0x104] sm:$0xf] }
  0x49   :  { %1419 = vmatpush.bf16.msrb.mxu3 %v2666_v14  ;;  %1355 = vmatmul.bf16.vlgmr.msra.gmra.mxu2 %v3757_v28  ;;  %v3126_v54 = vor.u32 %v3401_v48, %v3125_v46  ;;  %v3365_v57 = vld [vmem:[#allocation9 + $0x42c] sm:$0xf0]  ;;  %v2965_v5 = vld [vmem:[#allocation9 + $0x400] sm:$0xf]  ;;  %v3231_v14 = vld [vmem:[#allocation9 + $0x4] sm:$0xf] }
  0x4a   :  { %1378 = vmatpush.bf16.msrb.mxu0 %v3030_v27  ;;  %v3397_v0 = vld [vmem:[#allocation9 + $0x52c] sm:$0xf0]  ;;  %v2982_v6 = vor.u32 %v3365_v57, %v2981_v56  ;;  %v3093_v10 = vld [vmem:[#allocation9 + $0x500] sm:$0xf]  ;;  %v2583_v20 = vld [vmem:[#allocation9 + $0x110] sm:$0xf0]  ;;  %v2458_v37 = vor.u32 %v3231_v14, %v2455_v18 }
  0x4b   :  { %1392 = vmatpush.bf16.msrb.mxu1 %v3158_v30  ;;  %v3361_v9 = vld [vmem:[#allocation9 + $0x40c] sm:$0xf0]  ;;  %v3110_v12 = vor.u32 %v3397_v0, %v3109_v62  ;;  %v123_v15 = vld [vmem:[#allocation8 + $0x10] sm:$0xff]  ;;  %v2823_v26 = vld [vmem:[#allocation9 + $0x2f0] sm:$0xf0] }
  0x4c   :  { %1406 = vmatpush.bf16.msrb.mxu2 %v2522_v31  ;;  %v3393_v11 = vld [vmem:[#allocation9 + $0x50c] sm:$0xf0]  ;;  %v3323_v25 = vld [vmem:[#allocation9 + $0x2e4] sm:$0xf]  ;;  %v2966_v30 = vor.u32 %v3361_v9, %v2965_v5  ;;  %v2951_v31 = vld [vmem:[#allocation9 + $0x3f0] sm:$0xf0]  ;;  %v3765_v34 = vunpack.c.l.b16 %v123_v15  ;;  %v3769_v40 = vunpack.c.h.b16 %v123_v15 }
  0x4d   :  { %1420 = vmatpush.bf16.msrb.mxu3 %v2650_v35  ;;  %v3355_v27 = vld [vmem:[#allocation9 + $0x3e4] sm:$0xf]  ;;  %v3079_v33 = vld [vmem:[#allocation9 + $0x4f0] sm:$0xf0]  ;;  %v3767_v35 = vunpack.c.l.b16 %v126_v16  ;;  %v3094_v36 = vor.u32 %v3393_v11, %v3093_v10 }
  0x4e   :  { %1379 = vmatpush.bf16.msrb.mxu0 %v3014_v41  ;;  %v3387_v32 = vld [vmem:[#allocation9 + $0x4e4] sm:$0xf]  ;;  %v3207_v39 = vld [vmem:[#allocation9 + $0x5f0] sm:$0xf0]  ;;  %v3771_v41 = vunpack.c.h.b16 %v126_v16  ;;  %v2954_v44 = vor.u32 %v3355_v27, %v2951_v31 }
  0x4f   :  { %1393 = vmatpush.bf16.msrb.mxu1 %v3142_v42  ;;  %v3419_v38 = vld [vmem:[#allocation9 + $0x5e4] sm:$0xf]  ;;  %v2586_v42 = vor.u32 %v3263_v19, %v2583_v20  ;;  %v3082_v45 = vor.u32 %v3387_v32, %v3079_v33  ;;  %v3775_v50 = vpack.c.b16 %v3767_v35, %v3765_v34  ;;  %v2935_v51 = vld [vmem:[#allocation9 + $0x3d0] sm:$0xf0] }
  0x50   :  { %1407 = vmatpush.bf16.msrb.mxu2 %v2506_v43  ;;  %v2826_v43 = vor.u32 %v3323_v25, %v2823_v26  ;;  %v3319_v46 = vld [vmem:[#allocation9 + $0x2c4] sm:$0xf]  ;;  %v3210_v49 = vor.u32 %v3419_v38, %v3207_v39  ;;  %v3191_v56 = vld [vmem:[#allocation9 + $0x5d0] sm:$0xf0] }
  0x51   :  { %1421 = vmatpush.bf16.msrb.mxu3 %v2634_v47  ;;  %v2807_v47 = vld [vmem:[#allocation9 + $0x2d0] sm:$0xf0]  ;;  %v3351_v48 = vld [vmem:[#allocation9 + $0x3c4] sm:$0xf] }
  0x52   :  { %1380 = vmatpush.bf16.msrb.mxu0 %v2998_v53  ;;  %v3383_v52 = vld [vmem:[#allocation9 + $0x4c4] sm:$0xf]  ;;  %v3063_v53 = vld [vmem:[#allocation9 + $0x4d0] sm:$0xf0]  ;;  %v2810_v57 = vor.u32 %v3319_v46, %v2807_v47  ;;  %v2938_v62 = vor.u32 %v3351_v48, %v2935_v51 }
  0x53   :  { %1394 = vmatpush.bf16.msrb.mxu1 %v3126_v54  ;;  %v3779_v54 = vpack.c.b16 %v3771_v41, %v3769_v40  ;;  %v3315_v0 = vld [vmem:[#allocation9 + $0x2a4] sm:$0xf]  ;;  %v2791_v1 = vld [vmem:[#allocation9 + $0x2b0] sm:$0xf0] }
  0x54   :  { %1408 = vmatpush.bf16.msrb.mxu2 %v2490_v55  ;;  %v3415_v55 = vld [vmem:[#allocation9 + $0x5c4] sm:$0xf]  ;;  %v2919_v4 = vld [vmem:[#allocation9 + $0x3b0] sm:$0xf0]  ;;  %v2794_v11 = vor.u32 %v3315_v0, %v2791_v1 }
  0x55   :  { %1422 = vmatpush.bf16.msrb.mxu3 %v2618_v63  ;;  %v3066_v63 = vor.u32 %v3383_v52, %v3063_v53  ;;  %v3347_v2 = vld [vmem:[#allocation9 + $0x3a4] sm:$0xf]  ;;  %v3194_v3 = vor.u32 %v3415_v55, %v3191_v56  ;;  %v3175_v10 = vld [vmem:[#allocation9 + $0x5b0] sm:$0xf0] }
  0x56   :  { %1381 = vmatpush.bf16.msrb.mxu0 %v2982_v6  ;;  %v3379_v5 = vld [vmem:[#allocation9 + $0x4a4] sm:$0xf]  ;;  %v3047_v6 = vld [vmem:[#allocation9 + $0x4b0] sm:$0xf0] }
  0x57   :  { %1395 = vmatpush.bf16.msrb.mxu1 %v3110_v12  ;;  %v3411_v9 = vld [vmem:[#allocation9 + $0x5a4] sm:$0xf]  ;;  %v2922_v12 = vor.u32 %v3347_v2, %v2919_v4  ;;  %v2775_v15 = vld [vmem:[#allocation9 + $0x290] sm:$0xf0] }
  0x58   :  { %1409 = vmatpush.bf16.msrb.mxu2 %v2474_v13  ;;  %v3050_v13 = vor.u32 %v3379_v5, %v3047_v6  ;;  %v3311_v14 = vld [vmem:[#allocation9 + $0x284] sm:$0xf]  ;;  %v2903_v18 = vld [vmem:[#allocation9 + $0x390] sm:$0xf0] }
  0x59   :  { %1423 = vmatpush.bf16.msrb.mxu3 %v2602_v17  ;;  %v3343_v16 = vld [vmem:[#allocation9 + $0x384] sm:$0xf]  ;;  %v3178_v17 = vor.u32 %v3411_v9, %v3175_v10  ;;  %v3031_v20 = vld [vmem:[#allocation9 + $0x490] sm:$0xf0]  ;;  %v2778_v27 = vor.u32 %v3311_v14, %v2775_v15 }
  0x5a   :  { %1382 = vmatpush.bf16.msrb.mxu0 %v2966_v30  ;;  %v3375_v19 = vld [vmem:[#allocation9 + $0x484] sm:$0xf]  ;;  %v3159_v26 = vld [vmem:[#allocation9 + $0x590] sm:$0xf0]  ;;  %v2906_v30 = vor.u32 %v3343_v16, %v2903_v18 }
  0x5b   :  { %1396 = vmatpush.bf16.msrb.mxu1 %v3094_v36  ;;  %v3407_v25 = vld [vmem:[#allocation9 + $0x584] sm:$0xf]  ;;  %v3034_v31 = vor.u32 %v3375_v19, %v3031_v20  ;;  %v2759_v33 = vld [vmem:[#allocation9 + $0x270] sm:$0xf0] }
  0x5c   :  { %1410 = vmatpush.bf16.msrb.mxu2 %v2458_v37  ;;  %v3307_v32 = vld [vmem:[#allocation9 + $0x264] sm:$0xf]  ;;  %v3162_v37 = vor.u32 %v3407_v25, %v3159_v26  ;;  %v2887_v38 = vld [vmem:[#allocation9 + $0x370] sm:$0xf0] }
  0x5d   :  { %1424 = vmatpush.bf16.msrb.mxu3 %v2586_v42  ;;  %1383 = vmatmul.bf16.vlgmr.msrb.gmra.mxu0 %v3775_v50  ;;  %v3339_v36 = vld [vmem:[#allocation9 + $0x364] sm:$0xf]  ;;  %v3015_v42 = vld [vmem:[#allocation9 + $0x470] sm:$0xf0] }
  0x5e   :  { %1431 = vmatpush.bf16.msra.mxu0 %v2826_v43  ;;  %1397 = vmatmul.bf16.vlgmr.msrb.gmra.mxu1 %v3779_v54  ;;  %v3371_v39 = vld [vmem:[#allocation9 + $0x464] sm:$0xf]  ;;  %v2890_v46 = vor.u32 %v3339_v36, %v2887_v38  ;;  %v2871_v53 = vld [vmem:[#allocation9 + $0x350] sm:$0xf0]  ;;  %v2829_v38 = vld [vmem:[#allocation9 + $0x2e8] sm:$0xf] }
  0x5f   :  { %1445 = vmatpush.bf16.msra.mxu1 %v2954_v44  ;;  %1411 = vmatmul.bf16.vlgmr.msrb.gmra.mxu2 %v3739_v7  ;;  %v3403_v43 = vld [vmem:[#allocation9 + $0x564] sm:$0xf]  ;;  %v3143_v44 = vld [vmem:[#allocation9 + $0x570] sm:$0xf0]  ;;  %v3018_v47 = vor.u32 %v3371_v39, %v3015_v42  ;;  %v3326_v39 = vld [vmem:[#allocation9 + $0x2f4] sm:$0xf0] }
  0x60   :  { %1459 = vmatpush.bf16.msra.mxu2 %v3082_v45  ;;  %1425 = vmatmul.bf16.vlgmr.msrb.gmra.mxu3 %v3743_v8  ;;  %v2762_v45 = vor.u32 %v3307_v32, %v2759_v33  ;;  %v3303_v48 = vld [vmem:[#allocation9 + $0x244] sm:$0xf]  ;;  %v3146_v52 = vor.u32 %v3403_v43, %v3143_v44  ;;  %v2999_v56 = vld [vmem:[#allocation9 + $0x450] sm:$0xf0]  ;;  %v3262_v32 = vld [vmem:[#allocation9 + $0xf4] sm:$0xf0] }
  0x61   :  { %1473 = vmatpush.bf16.msra.mxu3 %v3210_v49  ;;  %v2743_v49 = vld [vmem:[#allocation9 + $0x250] sm:$0xf0]  ;;  %v3335_v51 = vld [vmem:[#allocation9 + $0x344] sm:$0xf]  ;;  %v2701_v33 = vld [vmem:[#allocation9 + $0x1e8] sm:$0xf] }
  0x62   :  { %1432 = vmatpush.bf16.msra.mxu0 %v2810_v57  ;;  %v3367_v55 = vld [vmem:[#allocation9 + $0x444] sm:$0xf]  ;;  %v2874_v0 = vor.u32 %v3335_v51, %v2871_v53  ;;  %v2855_v6 = vld [vmem:[#allocation9 + $0x330] sm:$0xf0]  ;;  %v2957_v44 = vld [vmem:[#allocation9 + $0x3e8] sm:$0xf] }
  0x63   :  { %1446 = vmatpush.bf16.msra.mxu1 %v2938_v62  ;;  %v3399_v57 = vld [vmem:[#allocation9 + $0x544] sm:$0xf]  ;;  %v3127_v62 = vld [vmem:[#allocation9 + $0x550] sm:$0xf0]  ;;  %v3002_v1 = vor.u32 %v3367_v55, %v2999_v56  ;;  %v2557_v51 = vld [vmem:[#allocation9 + $0xc8] sm:$0xf] }
  0x64   :  { %1460 = vmatpush.bf16.msra.mxu2 %v3066_v63  ;;  %v2746_v63 = vor.u32 %v3303_v48, %v2743_v49  ;;  %v3299_v2 = vld [vmem:[#allocation9 + $0x224] sm:$0xf]  ;;  %v3130_v5 = vor.u32 %v3399_v57, %v3127_v62  ;;  %v2983_v10 = vld [vmem:[#allocation9 + $0x430] sm:$0xf0]  ;;  %v2830_v49 = vor.u32 %v3326_v39, %v2829_v38  ;;  %v2685_v53 = vld [vmem:[#allocation9 + $0x1c8] sm:$0xf] }
  0x65   :  { %1474 = vmatpush.bf16.msra.mxu3 %v3194_v3  ;;  %v2727_v3 = vld [vmem:[#allocation9 + $0x230] sm:$0xf0]  ;;  %v3331_v4 = vld [vmem:[#allocation9 + $0x324] sm:$0xf]  ;;  %v3290_v56 = vld [vmem:[#allocation9 + $0x1d4] sm:$0xf0] }
  0x66   :  { %1433 = vmatpush.bf16.msra.mxu0 %v2794_v11  ;;  %v3363_v9 = vld [vmem:[#allocation9 + $0x424] sm:$0xf]  ;;  %v2711_v15 = vld [vmem:[#allocation9 + $0x210] sm:$0xf0]  ;;  %v2858_v16 = vor.u32 %v3331_v4, %v2855_v6  ;;  %v2813_v57 = vld [vmem:[#allocation9 + $0x2c8] sm:$0xf] }
  0x67   :  { %1447 = vmatpush.bf16.msra.mxu1 %v2922_v12  ;;  %v3395_v11 = vld [vmem:[#allocation9 + $0x524] sm:$0xf]  ;;  %v3111_v12 = vld [vmem:[#allocation9 + $0x530] sm:$0xf0]  ;;  %v3322_v62 = vld [vmem:[#allocation9 + $0x2d4] sm:$0xf0] }
  0x68   :  { %1461 = vmatpush.bf16.msra.mxu2 %v3050_v13  ;;  %v2730_v13 = vor.u32 %v3299_v2, %v2727_v3  ;;  %v3295_v14 = vld [vmem:[#allocation9 + $0x204] sm:$0xf]  ;;  %v2839_v19 = vld [vmem:[#allocation9 + $0x310] sm:$0xf0]  ;;  %v3114_v25 = vor.u32 %v3395_v11, %v3111_v12  ;;  %v2686_v2 = vor.u32 %v3290_v56, %v2685_v53  ;;  %v2814_v3 = vor.u32 %v3322_v62, %v2813_v57  ;;  %v2541_v4 = vld [vmem:[#allocation9 + $0xa8] sm:$0xf] }
  0x69   :  { %1475 = vmatpush.bf16.msra.mxu3 %v3178_v17  ;;  %v2986_v17 = vor.u32 %v3363_v9, %v2983_v10  ;;  %v3327_v18 = vld [vmem:[#allocation9 + $0x304] sm:$0xf]  ;;  %v2967_v26 = vld [vmem:[#allocation9 + $0x410] sm:$0xf0]  ;;  %v2714_v36 = vor.u32 %v3295_v14, %v2711_v15  ;;  %v2669_v6 = vld [vmem:[#allocation9 + $0x1a8] sm:$0xf] }
  0x6a   :  { %1434 = vmatpush.bf16.msra.mxu0 %v2778_v27  ;;  %v3359_v20 = vld [vmem:[#allocation9 + $0x404] sm:$0xf]  ;;  %v2842_v42 = vor.u32 %v3327_v18, %v2839_v19  ;;  %v3286_v10 = vld [vmem:[#allocation9 + $0x1b4] sm:$0xf0]  ;;  %v2797_v11 = vld [vmem:[#allocation9 + $0x2a8] sm:$0xf] }
  0x6b   :  { %1448 = vmatpush.bf16.msra.mxu1 %v2906_v30  ;;  %v3391_v27 = vld [vmem:[#allocation9 + $0x504] sm:$0xf]  ;;  %v3095_v30 = vld [vmem:[#allocation9 + $0x510] sm:$0xf0]  ;;  %v2970_v43 = vor.u32 %v3359_v20, %v2967_v26  ;;  %v3318_v12 = vld [vmem:[#allocation9 + $0x2b4] sm:$0xf0] }
  0x6c   :  { %1462 = vmatpush.bf16.msra.mxu2 %v3034_v31  ;;  %v2573_v31 = vld [vmem:[#allocation9 + $0xe8] sm:$0xf]  ;;  %v3350_v14 = vld [vmem:[#allocation9 + $0x3b4] sm:$0xf0] }
  0x6d   :  { %1476 = vmatpush.bf16.msra.mxu3 %v3162_v37  ;;  %v3294_v37 = vld [vmem:[#allocation9 + $0x1f4] sm:$0xf0]  ;;  %v2525_v18 = vld [vmem:[#allocation9 + $0x88] sm:$0xf] }
  0x6e   :  { %1435 = vmatpush.bf16.msra.mxu0 %v2762_v45  ;;  %v3358_v45 = vld [vmem:[#allocation9 + $0x3f4] sm:$0xf0]  ;;  %v2702_v48 = vor.u32 %v3294_v37, %v2701_v33  ;;  %v2653_v20 = vld [vmem:[#allocation9 + $0x188] sm:$0xf] }
  0x6f   :  { %1449 = vmatpush.bf16.msra.mxu1 %v2890_v46  ;;  %v3098_v46 = vor.u32 %v3391_v27, %v3095_v30  ;;  %v2958_v55 = vor.u32 %v3358_v45, %v2957_v44  ;;  %v3250_v19 = vld [vmem:[#allocation9 + $0x94] sm:$0xf0]  ;;  %v2781_v27 = vld [vmem:[#allocation9 + $0x288] sm:$0xf] }
  0x70   :  { %1463 = vmatpush.bf16.msra.mxu2 %v3018_v47  ;;  %v2574_v47 = vor.u32 %v3262_v32, %v2573_v31  ;;  %v3282_v26 = vld [vmem:[#allocation9 + $0x194] sm:$0xf0]  ;;  %v2909_v31 = vld [vmem:[#allocation9 + $0x388] sm:$0xf]  ;;  %v2526_v33 = vor.u32 %v3250_v19, %v2525_v18 }
  0x71   :  { %1477 = vmatpush.bf16.msra.mxu3 %v3146_v52  ;;  %v3258_v52 = vld [vmem:[#allocation9 + $0xd4] sm:$0xf0]  ;;  %v2509_v38 = vld [vmem:[#allocation9 + $0x68] sm:$0xf] }
  0x72   :  { %1436 = vmatpush.bf16.msra.mxu0 %v2746_v63  ;;  %v2941_v63 = vld [vmem:[#allocation9 + $0x3c8] sm:$0xf]  ;;  %v3314_v30 = vld [vmem:[#allocation9 + $0x294] sm:$0xf0] }
  0x73   :  { %1450 = vmatpush.bf16.msra.mxu1 %v2874_v0  ;;  %v3354_v0 = vld [vmem:[#allocation9 + $0x3d4] sm:$0xf0]  ;;  %v2782_v37 = vor.u32 %v3314_v30, %v2781_v27  ;;  %v2765_v45 = vld [vmem:[#allocation9 + $0x268] sm:$0xf] }
  0x74   :  { %1464 = vmatpush.bf16.msra.mxu2 %v3002_v1  ;;  %v2558_v1 = vor.u32 %v3258_v52, %v2557_v51  ;;  %v2942_v9 = vor.u32 %v3354_v0, %v2941_v63  ;;  %v3346_v32 = vld [vmem:[#allocation9 + $0x394] sm:$0xf0]  ;;  %v2493_v53 = vld [vmem:[#allocation9 + $0x48] sm:$0xf] }
  0x75   :  { %1478 = vmatpush.bf16.msra.mxu3 %v3130_v5  ;;  %v3254_v5 = vld [vmem:[#allocation9 + $0xb4] sm:$0xf0]  ;;  %v2621_v56 = vld [vmem:[#allocation9 + $0x148] sm:$0xf] }
  0x76   :  { %1437 = vmatpush.bf16.msra.mxu0 %v2730_v13  ;;  %v2925_v13 = vld [vmem:[#allocation9 + $0x3a8] sm:$0xf]  ;;  %v2542_v15 = vor.u32 %v3254_v5, %v2541_v4  ;;  %v3246_v39 = vld [vmem:[#allocation9 + $0x74] sm:$0xf0] }
  0x77   :  { %1451 = vmatpush.bf16.msra.mxu1 %v2858_v16  ;;  %v2670_v16 = vor.u32 %v3286_v10, %v2669_v6  ;;  %v3278_v44 = vld [vmem:[#allocation9 + $0x174] sm:$0xf0]  ;;  %v2749_v63 = vld [vmem:[#allocation9 + $0x248] sm:$0xf] }
  0x78   :  { %1465 = vmatpush.bf16.msra.mxu2 %v2986_v17  ;;  %v2798_v17 = vor.u32 %v3318_v12, %v2797_v11  ;;  %v3274_v62 = vld [vmem:[#allocation9 + $0x154] sm:$0xf0]  ;;  %v2477_v6 = vld [vmem:[#allocation9 + $0x28] sm:$0xf] }
  0x79   :  { %1479 = vmatpush.bf16.msra.mxu3 %v3114_v25  ;;  %v2926_v25 = vor.u32 %v3350_v14, %v2925_v13  ;;  %v3306_v0 = vld [vmem:[#allocation9 + $0x254] sm:$0xf0]  ;;  %v2622_v4 = vor.u32 %v3274_v62, %v2621_v56  ;;  %v2605_v10 = vld [vmem:[#allocation9 + $0x128] sm:$0xf] }
  0x7a   :  { %1438 = vmatpush.bf16.msra.mxu0 %v2714_v36  ;;  %v2654_v36 = vor.u32 %v3282_v26, %v2653_v20  ;;  %v2750_v5 = vor.u32 %v3306_v0, %v2749_v63  ;;  %v3270_v12 = vld [vmem:[#allocation9 + $0x134] sm:$0xf0]  ;;  %v2733_v13 = vld [vmem:[#allocation9 + $0x228] sm:$0xf] }
  0x7b   :  { %1452 = vmatpush.bf16.msra.mxu1 %v2842_v42  ;;  %v2637_v42 = vld [vmem:[#allocation9 + $0x168] sm:$0xf]  ;;  %v3302_v14 = vld [vmem:[#allocation9 + $0x234] sm:$0xf0]  ;;  %v2606_v20 = vor.u32 %v3270_v12, %v2605_v10 }
  0x7c   :  { %1466 = vmatpush.bf16.msra.mxu2 %v2970_v43  ;;  %v2910_v43 = vor.u32 %v3346_v32, %v2909_v31  ;;  %v2638_v51 = vor.u32 %v3278_v44, %v2637_v42  ;;  %v2461_v18 = vld [vmem:[#allocation9 + $0x8] sm:$0xf]  ;;  %v3234_v19 = vld [vmem:[#allocation9 + $0x14] sm:$0xf0]  ;;  %v3260_v44 = vld [vmem:[#allocation9 + $0xec] sm:$0xf] }
  0x7d   :  { %1480 = vmatpush.bf16.msra.mxu3 %v3098_v46  ;;  %1439 = vmatmul.bf16.vlgmr.msra.gmra.mxu0 %v3757_v28  ;;  %v3310_v46 = vld [vmem:[#allocation9 + $0x274] sm:$0xf0]  ;;  %v2589_v26 = vld [vmem:[#allocation9 + $0x108] sm:$0xf]  ;;  %v2462_v42 = vor.u32 %v3234_v19, %v2461_v18  ;;  %v2671_v18 = vld [vmem:[#allocation9 + $0x1b8] sm:$0xf0] }
  0x7e   :  { %1487 = vmatpush.bf16.msrb.mxu0 %v2574_v47  ;;  %1453 = vmatmul.bf16.vlgmr.msra.gmra.mxu1 %v3761_v29  ;;  %v2893_v47 = vld [vmem:[#allocation9 + $0x368] sm:$0xf]  ;;  %v2766_v52 = vor.u32 %v3310_v46, %v2765_v45  ;;  %v3266_v27 = vld [vmem:[#allocation9 + $0x114] sm:$0xf0]  ;;  %v2575_v45 = vld [vmem:[#allocation9 + $0xf8] sm:$0xf0] }
  0x7f   :  { %1501 = vmatpush.bf16.msrb.mxu1 %v2702_v48  ;;  %1467 = vmatmul.bf16.vlgmr.msra.gmra.mxu2 %v3775_v50  ;;  %v3342_v48 = vld [vmem:[#allocation9 + $0x374] sm:$0xf0]  ;;  %v2717_v30 = vld [vmem:[#allocation9 + $0x208] sm:$0xf]  ;;  %v2590_v46 = vor.u32 %v3266_v27, %v2589_v26 }
  0x80   :  { %1515 = vmatpush.bf16.msrb.mxu2 %v2830_v49  ;;  %1481 = vmatmul.bf16.vlgmr.msra.gmra.mxu3 %v3779_v54  ;;  %v2510_v49 = vor.u32 %v3246_v39, %v2509_v38  ;;  %v2894_v57 = vor.u32 %v3342_v48, %v2893_v47  ;;  %v3298_v32 = vld [vmem:[#allocation9 + $0x214] sm:$0xf0]  ;;  %v3213_v39 = vld [vmem:[#allocation9 + $0x5e8] sm:$0xf]  ;;  %v3292_v48 = vld [vmem:[#allocation9 + $0x1ec] sm:$0xf] }
  0x81   :  { %1529 = vmatpush.bf16.msrb.mxu3 %v2958_v55  ;;  %v3242_v55 = vld [vmem:[#allocation9 + $0x54] sm:$0xf0]  ;;  %v2718_v47 = vor.u32 %v3298_v32, %v2717_v30  ;;  %v3069_v56 = vld [vmem:[#allocation9 + $0x4c8] sm:$0xf] }
  0x82   :  { %1488 = vmatpush.bf16.msrb.mxu0 %v2558_v1  ;;  %v2877_v1 = vld [vmem:[#allocation9 + $0x348] sm:$0xf]  ;;  %v3390_v38 = vld [vmem:[#allocation9 + $0x4f4] sm:$0xf0] }
  0x83   :  { %1502 = vmatpush.bf16.msrb.mxu1 %v2686_v2  ;;  %v3338_v2 = vld [vmem:[#allocation9 + $0x354] sm:$0xf0]  ;;  %v3197_v62 = vld [vmem:[#allocation9 + $0x5c8] sm:$0xf] }
  0x84   :  { %1516 = vmatpush.bf16.msrb.mxu2 %v2814_v3  ;;  %v2494_v3 = vor.u32 %v3242_v55, %v2493_v53  ;;  %v2878_v11 = vor.u32 %v3338_v2, %v2877_v1  ;;  %v2578_v55 = vor.u32 %v3260_v44, %v2575_v45  ;;  %v3418_v0 = vld [vmem:[#allocation9 + $0x5d4] sm:$0xf0]  ;;  %v3256_v1 = vld [vmem:[#allocation9 + $0xcc] sm:$0xf]  ;;  %v2559_v2 = vld [vmem:[#allocation9 + $0xd8] sm:$0xf0] }
  0x85   :  { %1530 = vmatpush.bf16.msrb.mxu3 %v2942_v9  ;;  %v3238_v9 = vld [vmem:[#allocation9 + $0x34] sm:$0xf0]  ;;  %v3053_v10 = vld [vmem:[#allocation9 + $0x4a8] sm:$0xf] }
  0x86   :  { %1489 = vmatpush.bf16.msrb.mxu0 %v2542_v15  ;;  %v2861_v15 = vld [vmem:[#allocation9 + $0x328] sm:$0xf]  ;;  %v3378_v27 = vld [vmem:[#allocation9 + $0x494] sm:$0xf0] }
  0x87   :  { %1503 = vmatpush.bf16.msrb.mxu1 %v2670_v16  ;;  %v3334_v16 = vld [vmem:[#allocation9 + $0x334] sm:$0xf0]  ;;  %v3181_v12 = vld [vmem:[#allocation9 + $0x5a8] sm:$0xf] }
  0x88   :  { %1517 = vmatpush.bf16.msrb.mxu2 %v2798_v17  ;;  %v2478_v17 = vor.u32 %v3238_v9, %v2477_v6  ;;  %v2862_v31 = vor.u32 %v3334_v16, %v2861_v15  ;;  %v3198_v6 = vor.u32 %v3418_v0, %v3197_v62  ;;  %v2562_v9 = vor.u32 %v3256_v1, %v2559_v2  ;;  %v3252_v15 = vld [vmem:[#allocation9 + $0xac] sm:$0xf]  ;;  %v2543_v16 = vld [vmem:[#allocation9 + $0xb8] sm:$0xf0]  ;;  %v3037_v26 = vld [vmem:[#allocation9 + $0x488] sm:$0xf] }
  0x89   :  { %1531 = vmatpush.bf16.msrb.mxu3 %v2926_v25  ;;  %v2734_v25 = vor.u32 %v3302_v14, %v2733_v13  ;;  %v3414_v14 = vld [vmem:[#allocation9 + $0x5b4] sm:$0xf0]  ;;  %v3165_v30 = vld [vmem:[#allocation9 + $0x588] sm:$0xf] }
  0x8a   :  { %1490 = vmatpush.bf16.msrb.mxu0 %v2526_v33  ;;  %v2845_v33 = vld [vmem:[#allocation9 + $0x308] sm:$0xf]  ;;  %v3410_v32 = vld [vmem:[#allocation9 + $0x594] sm:$0xf0] }
  0x8b   :  { %1504 = vmatpush.bf16.msrb.mxu1 %v2654_v36  ;;  %v3330_v36 = vld [vmem:[#allocation9 + $0x314] sm:$0xf0]  ;;  %v3021_v44 = vld [vmem:[#allocation9 + $0x468] sm:$0xf] }
  0x8c   :  { %1518 = vmatpush.bf16.msrb.mxu2 %v2782_v37  ;;  %v3085_v37 = vld [vmem:[#allocation9 + $0x4e8] sm:$0xf]  ;;  %v3374_v45 = vld [vmem:[#allocation9 + $0x474] sm:$0xf0] }
  0x8d   :  { %1532 = vmatpush.bf16.msrb.mxu3 %v2910_v43  ;;  %v3422_v43 = vld [vmem:[#allocation9 + $0x5f4] sm:$0xf0]  ;;  %v3005_v62 = vld [vmem:[#allocation9 + $0x448] sm:$0xf] }
  0x8e   :  { %1491 = vmatpush.bf16.msrb.mxu0 %v2510_v49  ;;  %v2703_v49 = vld [vmem:[#allocation9 + $0x1f8] sm:$0xf0]  ;;  %v3214_v53 = vor.u32 %v3422_v43, %v3213_v39  ;;  %v3038_v39 = vor.u32 %v3378_v27, %v3037_v26  ;;  %v3133_v0 = vld [vmem:[#allocation9 + $0x548] sm:$0xf]  ;;  %v3402_v2 = vld [vmem:[#allocation9 + $0x554] sm:$0xf0] }
  0x8f   :  { %1505 = vmatpush.bf16.msrb.mxu1 %v2638_v51  ;;  %v2846_v51 = vor.u32 %v3330_v36, %v2845_v33  ;;  %v2706_v63 = vor.u32 %v3292_v48, %v2703_v49  ;;  %v3248_v33 = vld [vmem:[#allocation9 + $0x8c] sm:$0xf]  ;;  %v2527_v36 = vld [vmem:[#allocation9 + $0x98] sm:$0xf0]  ;;  %v3406_v48 = vld [vmem:[#allocation9 + $0x574] sm:$0xf0] }
  0x90   :  { %1519 = vmatpush.bf16.msrb.mxu2 %v2766_v52  ;;  %v3086_v52 = vor.u32 %v3390_v38, %v3085_v37  ;;  %v3280_v37 = vld [vmem:[#allocation9 + $0x18c] sm:$0xf]  ;;  %v2655_v38 = vld [vmem:[#allocation9 + $0x198] sm:$0xf0]  ;;  %v2530_v43 = vor.u32 %v3248_v33, %v2527_v36  ;;  %v2973_v26 = vld [vmem:[#allocation9 + $0x408] sm:$0xf] }
  0x91   :  { %1533 = vmatpush.bf16.msrb.mxu3 %v2894_v57  ;;  %v3386_v57 = vld [vmem:[#allocation9 + $0x4d4] sm:$0xf0]  ;;  %v3244_v49 = vld [vmem:[#allocation9 + $0x6c] sm:$0xf] }
  0x92   :  { %1492 = vmatpush.bf16.msrb.mxu0 %v2494_v3  ;;  %v3288_v3 = vld [vmem:[#allocation9 + $0x1cc] sm:$0xf]  ;;  %v3362_v27 = vld [vmem:[#allocation9 + $0x414] sm:$0xf0] }
  0x93   :  { %1506 = vmatpush.bf16.msrb.mxu1 %v2622_v4  ;;  %v2687_v4 = vld [vmem:[#allocation9 + $0x1d8] sm:$0xf0]  ;;  %v3394_v33 = vld [vmem:[#allocation9 + $0x514] sm:$0xf0]  ;;  %v3232_v36 = vld [vmem:[#allocation9 + $0xc] sm:$0xf] }
  0x94   :  { %1520 = vmatpush.bf16.msrb.mxu2 %v2750_v5  ;;  %v3070_v5 = vor.u32 %v3386_v57, %v3069_v56  ;;  %v2690_v13 = vor.u32 %v3288_v3, %v2687_v4  ;;  %v3240_v3 = vld [vmem:[#allocation9 + $0x4c] sm:$0xf]  ;;  %v2495_v4 = vld [vmem:[#allocation9 + $0x58] sm:$0xf0] }
  0x95   :  { %1534 = vmatpush.bf16.msrb.mxu3 %v2878_v11  ;;  %v3382_v11 = vld [vmem:[#allocation9 + $0x4b4] sm:$0xf0] }
  0x96   :  { %1493 = vmatpush.bf16.msrb.mxu0 %v2478_v17  ;;  %v3284_v17 = vld [vmem:[#allocation9 + $0x1ac] sm:$0xf]  ;;  %v3054_v19 = vor.u32 %v3382_v11, %v3053_v10  ;;  %v3134_v10 = vor.u32 %v3402_v2, %v3133_v0  ;;  %v2498_v11 = vor.u32 %v3240_v3, %v2495_v4  ;;  %v2943_v4 = vld [vmem:[#allocation9 + $0x3d8] sm:$0xf0] }
  0x97   :  { %1507 = vmatpush.bf16.msrb.mxu1 %v2606_v20  ;;  %v3182_v20 = vor.u32 %v3414_v14, %v3181_v12  ;;  %v2989_v12 = vld [vmem:[#allocation9 + $0x428] sm:$0xf]  ;;  %v3320_v0 = vld [vmem:[#allocation9 + $0x2cc] sm:$0xf] }
  0x98   :  { %1521 = vmatpush.bf16.msrb.mxu2 %v2734_v25  ;;  %v2546_v25 = vor.u32 %v3252_v15, %v2543_v16  ;;  %v3117_v14 = vld [vmem:[#allocation9 + $0x528] sm:$0xf]  ;;  %v3398_v16 = vld [vmem:[#allocation9 + $0x534] sm:$0xf0]  ;;  %v3352_v2 = vld [vmem:[#allocation9 + $0x3cc] sm:$0xf] }
  0x99   :  { %1535 = vmatpush.bf16.msrb.mxu3 %v2862_v31  ;;  %v2674_v31 = vor.u32 %v3284_v17, %v2671_v18  ;;  %v3236_v17 = vld [vmem:[#allocation9 + $0x2c] sm:$0xf]  ;;  %v2479_v18 = vld [vmem:[#allocation9 + $0x38] sm:$0xf0] }
  0x9a   :  { %1494 = vmatpush.bf16.msrb.mxu0 %v2462_v42  ;;  %v3166_v42 = vor.u32 %v3410_v32, %v3165_v30  ;;  %v3118_v30 = vor.u32 %v3398_v16, %v3117_v14  ;;  %v3101_v32 = vld [vmem:[#allocation9 + $0x508] sm:$0xf]  ;;  %v3316_v14 = vld [vmem:[#allocation9 + $0x2ac] sm:$0xf] }
  0x9b   :  { %1508 = vmatpush.bf16.msrb.mxu1 %v2590_v46  ;;  %v3149_v46 = vld [vmem:[#allocation9 + $0x568] sm:$0xf]  ;;  %v3348_v16 = vld [vmem:[#allocation9 + $0x3ac] sm:$0xf] }
  0x9c   :  { %1522 = vmatpush.bf16.msrb.mxu2 %v2718_v47  ;;  %v2658_v47 = vor.u32 %v3280_v37, %v2655_v38  ;;  %v3150_v56 = vor.u32 %v3406_v48, %v3149_v46  ;;  %v2463_v38 = vld [vmem:[#allocation9 + $0x18] sm:$0xf0]  ;;  %v2974_v46 = vor.u32 %v3362_v27, %v2973_v26  ;;  %v3388_v48 = vld [vmem:[#allocation9 + $0x4ec] sm:$0xf] }
  0x9d   :  { %1536 = vmatpush.bf16.msrb.mxu3 %v2846_v51  ;;  %1495 = vmatmul.bf16.vlgmr.msrb.gmra.mxu0 %v3739_v7  ;;  %v2511_v51 = vld [vmem:[#allocation9 + $0x78] sm:$0xf0] }
  0x9e   :  { %1543 = vmatpush.bf16.msra.mxu0 %v3086_v52  ;;  %1509 = vmatmul.bf16.vlgmr.msrb.gmra.mxu1 %v3743_v8  ;;  %v3276_v52 = vld [vmem:[#allocation9 + $0x16c] sm:$0xf]  ;;  %v2514_v57 = vor.u32 %v3244_v49, %v2511_v51  ;;  %v3087_v49 = vld [vmem:[#allocation9 + $0x4f8] sm:$0xf0]  ;;  %v3102_v51 = vor.u32 %v3394_v33, %v3101_v32 }
  0x9f   :  { %1557 = vmatpush.bf16.msra.mxu1 %v3214_v53  ;;  %1523 = vmatmul.bf16.vlgmr.msrb.gmra.mxu2 %v3757_v28  ;;  %v2639_v53 = vld [vmem:[#allocation9 + $0x178] sm:$0xf0]  ;;  %v3312_v32 = vld [vmem:[#allocation9 + $0x28c] sm:$0xf] }
  0xa0   :  { %1571 = vmatpush.bf16.msra.mxu2 %v2578_v55  ;;  %1537 = vmatmul.bf16.vlgmr.msrb.gmra.mxu3 %v3761_v29  ;;  %v3022_v55 = vor.u32 %v3374_v45, %v3021_v44  ;;  %v2642_v1 = vor.u32 %v3276_v52, %v2639_v53  ;;  %v2831_v44 = vld [vmem:[#allocation9 + $0x2f8] sm:$0xf0]  ;;  %v3356_v45 = vld [vmem:[#allocation9 + $0x3ec] sm:$0xf]  ;;  %v2466_v52 = vor.u32 %v3232_v36, %v2463_v38 }
  0xa1   :  { %1585 = vmatpush.bf16.msra.mxu3 %v2706_v63  ;;  %v3370_v63 = vld [vmem:[#allocation9 + $0x454] sm:$0xf0]  ;;  %v3420_v53 = vld [vmem:[#allocation9 + $0x5ec] sm:$0xf]  ;;  %v3183_v26 = vld [vmem:[#allocation9 + $0x5b8] sm:$0xf0] }
  0xa2   :  { %1544 = vmatpush.bf16.msra.mxu0 %v3070_v5  ;;  %v3272_v5 = vld [vmem:[#allocation9 + $0x14c] sm:$0xf]  ;;  %v2783_v33 = vld [vmem:[#allocation9 + $0x298] sm:$0xf0] }
  0xa3   :  { %1558 = vmatpush.bf16.msra.mxu1 %v3198_v6  ;;  %v2623_v6 = vld [vmem:[#allocation9 + $0x158] sm:$0xf0]  ;;  %v3344_v36 = vld [vmem:[#allocation9 + $0x38c] sm:$0xf] }
  0xa4   :  { %1572 = vmatpush.bf16.msra.mxu2 %v2562_v9  ;;  %v3006_v9 = vor.u32 %v3370_v63, %v3005_v62  ;;  %v2626_v15 = vor.u32 %v3272_v5, %v2623_v6  ;;  %v3090_v63 = vor.u32 %v3388_v48, %v3087_v49  ;;  %v3384_v5 = vld [vmem:[#allocation9 + $0x4cc] sm:$0xf]  ;;  %v3071_v6 = vld [vmem:[#allocation9 + $0x4d8] sm:$0xf0] }
  0xa5   :  { %1586 = vmatpush.bf16.msra.mxu3 %v2690_v13  ;;  %v3366_v13 = vld [vmem:[#allocation9 + $0x434] sm:$0xf0]  ;;  %v2911_v38 = vld [vmem:[#allocation9 + $0x398] sm:$0xf0]  ;;  %v3340_v48 = vld [vmem:[#allocation9 + $0x36c] sm:$0xf] }
  0xa6   :  { %1545 = vmatpush.bf16.msra.mxu0 %v3054_v19  ;;  %v3268_v19 = vld [vmem:[#allocation9 + $0x12c] sm:$0xf] }
  0xa7   :  { %1559 = vmatpush.bf16.msra.mxu1 %v3182_v20  ;;  %v2607_v20 = vld [vmem:[#allocation9 + $0x138] sm:$0xf0] }
  0xa8   :  { %1573 = vmatpush.bf16.msra.mxu2 %v2546_v25  ;;  %v2990_v25 = vor.u32 %v3366_v13, %v2989_v12  ;;  %v2610_v37 = vor.u32 %v3268_v19, %v2607_v20  ;;  %v2946_v12 = vor.u32 %v3352_v2, %v2943_v4  ;;  %v3074_v13 = vor.u32 %v3384_v5, %v3071_v6  ;;  %v3380_v19 = vld [vmem:[#allocation9 + $0x4ac] sm:$0xf]  ;;  %v3055_v20 = vld [vmem:[#allocation9 + $0x4b8] sm:$0xf0] }
  0xa9   :  { %1587 = vmatpush.bf16.msra.mxu3 %v2674_v31  ;;  %v2482_v31 = vor.u32 %v3236_v17, %v2479_v18  ;;  %v2927_v18 = vld [vmem:[#allocation9 + $0x3b8] sm:$0xf0]  ;;  %v3336_v2 = vld [vmem:[#allocation9 + $0x34c] sm:$0xf] }
  0xaa   :  { %1546 = vmatpush.bf16.msra.mxu0 %v3038_v39  ;;  %v3264_v39 = vld [vmem:[#allocation9 + $0x10c] sm:$0xf]  ;;  %v3007_v6 = vld [vmem:[#allocation9 + $0x458] sm:$0xf0] }
  0xab   :  { %1560 = vmatpush.bf16.msra.mxu1 %v3166_v42  ;;  %v2591_v42 = vld [vmem:[#allocation9 + $0x118] sm:$0xf0]  ;;  %v3368_v5 = vld [vmem:[#allocation9 + $0x44c] sm:$0xf] }
  0xac   :  { %1574 = vmatpush.bf16.msra.mxu2 %v2530_v43  ;;  %v3324_v43 = vld [vmem:[#allocation9 + $0x2ec] sm:$0xf] }
  0xad   :  { %1588 = vmatpush.bf16.msra.mxu3 %v2658_v47  ;;  %v2959_v47 = vld [vmem:[#allocation9 + $0x3f8] sm:$0xf0] }
  0xae   :  { %1547 = vmatpush.bf16.msra.mxu0 %v3022_v55  ;;  %v3215_v55 = vld [vmem:[#allocation9 + $0x5f8] sm:$0xf0]  ;;  %v2962_v62 = vor.u32 %v3356_v45, %v2959_v47  ;;  %v2914_v45 = vor.u32 %v3344_v36, %v2911_v38  ;;  %v3296_v38 = vld [vmem:[#allocation9 + $0x20c] sm:$0xf] }
  0xaf   :  { %1561 = vmatpush.bf16.msra.mxu1 %v3150_v56  ;;  %v2594_v56 = vor.u32 %v3264_v39, %v2591_v42  ;;  %v3218_v3 = vor.u32 %v3420_v53, %v3215_v55  ;;  %v3376_v39 = vld [vmem:[#allocation9 + $0x48c] sm:$0xf]  ;;  %v3039_v42 = vld [vmem:[#allocation9 + $0x498] sm:$0xf0] }
  0xb0   :  { %1575 = vmatpush.bf16.msra.mxu2 %v2514_v57  ;;  %v2834_v57 = vor.u32 %v3324_v43, %v2831_v44  ;;  %v3408_v43 = vld [vmem:[#allocation9 + $0x58c] sm:$0xf]  ;;  %v2786_v44 = vor.u32 %v3312_v32, %v2783_v33  ;;  %v2767_v47 = vld [vmem:[#allocation9 + $0x278] sm:$0xf0] }
  0xb1   :  { %1589 = vmatpush.bf16.msra.mxu3 %v2642_v1  ;;  %v2815_v1 = vld [vmem:[#allocation9 + $0x2d8] sm:$0xf0]  ;;  %v3404_v55 = vld [vmem:[#allocation9 + $0x56c] sm:$0xf] }
  0xb2   :  { %1548 = vmatpush.bf16.msra.mxu0 %v3006_v9  ;;  %v3416_v9 = vld [vmem:[#allocation9 + $0x5cc] sm:$0xf]  ;;  %v3023_v53 = vld [vmem:[#allocation9 + $0x478] sm:$0xf0] }
  0xb3   :  { %1562 = vmatpush.bf16.msra.mxu1 %v3134_v10  ;;  %v3199_v10 = vld [vmem:[#allocation9 + $0x5d8] sm:$0xf0] }
  0xb4   :  { %1576 = vmatpush.bf16.msra.mxu2 %v2498_v11  ;;  %v2818_v11 = vor.u32 %v3320_v0, %v2815_v1  ;;  %v3202_v17 = vor.u32 %v3416_v9, %v3199_v10  ;;  %v2751_v1 = vld [vmem:[#allocation9 + $0x258] sm:$0xf0]  ;;  %v3800_v9 = vld [vmem:[%s3938_s4] sm:$0xf]  ;;  %s3660_s4 = smov [#allocation13]  }
  0xb5   :  { %1590 = vmatpush.bf16.msra.mxu3 %v2626_v15  ;;  %v2799_v15 = vld [vmem:[#allocation9 + $0x2b8] sm:$0xf0]  ;;  %v3400_v10 = vld [vmem:[#allocation9 + $0x54c] sm:$0xf]  ;;  %s2429_s10 = sshll.u32 %s3660_s4, 4  ;;  %s2430_s10 = int_to_ptr.vmem [resolvable:$true] %s2429_s10 }
  0xb6   :  { %1549 = vmatpush.bf16.msra.mxu0 %v2990_v25  ;;  %v3412_v25 = vld [vmem:[#allocation9 + $0x5ac] sm:$0xf]  ;;  %v2802_v27 = vor.u32 %v3316_v14, %v2799_v15  ;;  %v3010_v15 = vor.u32 %v3368_v5, %v3007_v6  ;;  %v3119_v32 = vld [vmem:[#allocation9 + $0x538] sm:$0xf0] }
  0xb7   :  { %1563 = vmatpush.bf16.msra.mxu1 %v3118_v30  ;;  %v2930_v30 = vor.u32 %v3348_v16, %v2927_v18  ;;  %v321_v16 = vperm.slane %v3800_v9, 0  ;;  %v2735_v18 = vld [vmem:[#allocation9 + $0x238] sm:$0xf0] }
  0xb8   :  { %1577 = vmatpush.bf16.msra.mxu2 %v2482_v31  ;;  %v3058_v31 = vor.u32 %v3380_v19, %v3055_v20  ;;  %v3332_v19 = vld [vmem:[#allocation9 + $0x32c] sm:$0xf] }
  0xb9   :  { %1591 = vmatpush.bf16.msra.mxu3 %v2610_v37  ;;  %v3186_v37 = vor.u32 %v3412_v25, %v3183_v26  ;;  %v2863_v25 = vld [vmem:[#allocation9 + $0x338] sm:$0xf0]  ;;  %v3364_v26 = vld [vmem:[#allocation9 + $0x42c] sm:$0xf] }
  0xba   :  { %1550 = vmatpush.bf16.msra.mxu0 %v2974_v46  ;;  %v3308_v46 = vld [vmem:[#allocation9 + $0x26c] sm:$0xf]  ;;  %v2866_v36 = vor.u32 %v3332_v19, %v2863_v25 }
  0xbb   :  { %1564 = vmatpush.bf16.msra.mxu1 %v3102_v51  ;;  %v2895_v51 = vld [vmem:[#allocation9 + $0x378] sm:$0xf0] }
  0xbc   :  { %1578 = vmatpush.bf16.msra.mxu2 %v2466_v52  ;;  %v3372_v52 = vld [vmem:[#allocation9 + $0x46c] sm:$0xf] }
  0xbd   :  { %1592 = vmatpush.bf16.msra.mxu3 %v2594_v56  ;;  %1551 = vmatmul.bf16.vlgmr.msra.gmra.mxu0 %v3775_v50  ;;  %v3151_v56 = vld [vmem:[#allocation9 + $0x578] sm:$0xf0]  ;;  %v3026_v0 = vor.u32 %v3372_v52, %v3023_v53 }
  0xbe   :  { %1599 = vmatpush.bf16.msrb.mxu0 %v2834_v57  ;;  %1565 = vmatmul.bf16.vlgmr.msra.gmra.mxu1 %v3779_v54  ;;  %v2770_v57 = vor.u32 %v3308_v46, %v2767_v47  ;;  %v3154_v4 = vor.u32 %v3404_v55, %v3151_v56  ;;  %v3392_v46 = vld [vmem:[#allocation9 + $0x50c] sm:$0xf]  ;;  %v3103_v47 = vld [vmem:[#allocation9 + $0x518] sm:$0xf0] }
  0xbf   :  { %1613 = vmatpush.bf16.msrb.mxu1 %v2962_v62  ;;  %1579 = vmatmul.bf16.vlgmr.msra.gmra.mxu2 %v3739_v7  ;;  %v3167_v7 = vld [vmem:[#allocation9 + $0x598] sm:$0xf0]  ;;  %v3304_v62 = vld [vmem:[#allocation9 + $0x24c] sm:$0xf]  ;;  %v3106_v55 = vor.u32 %v3392_v46, %v3103_v47 }
  0xc0   :  { %1627 = vmatpush.bf16.msrb.mxu2 %v3090_v63  ;;  %1593 = vmatmul.bf16.vlgmr.msra.gmra.mxu3 %v3743_v8  ;;  %v3042_v8 = vor.u32 %v3376_v39, %v3039_v42  ;;  %v3170_v49 = vor.u32 %v3408_v43, %v3167_v7  ;;  %v2898_v63 = vor.u32 %v3340_v48, %v2895_v51  ;;  %v2719_v39 = vld [vmem:[#allocation9 + $0x218] sm:$0xf0]  ;;  %v3328_v42 = vld [vmem:[#allocation9 + $0x30c] sm:$0xf] }
  0xc1   :  { %1641 = vmatpush.bf16.msrb.mxu3 %v3218_v3  ;;  %v2879_v3 = vld [vmem:[#allocation9 + $0x358] sm:$0xf0]  ;;  %v2722_v48 = vor.u32 %v3296_v38, %v2719_v39 }
  0xc2   :  { %1600 = vmatpush.bf16.msrb.mxu0 %v2818_v11  ;;  %v3135_v11 = vld [vmem:[#allocation9 + $0x558] sm:$0xf0]  ;;  %v2882_v14 = vor.u32 %v3336_v2, %v2879_v3 }
  0xc3   :  { %1614 = vmatpush.bf16.msrb.mxu1 %v2946_v12  ;;  %v2754_v12 = vor.u32 %v3304_v62, %v2751_v1  ;;  %v3138_v20 = vor.u32 %v3400_v10, %v3135_v11 }
  0xc4   :  { %1628 = vmatpush.bf16.msrb.mxu2 %v3074_v13  ;;  %v3300_v13 = vld [vmem:[#allocation9 + $0x22c] sm:$0xf] }
  0xc5   :  { %1642 = vmatpush.bf16.msrb.mxu3 %v3202_v17  ;;  %v1328_v17 = vpop.f32.mrf.mxu0  ;;  %v2738_v33 = vor.u32 %v3300_v13, %v2735_v18  ;;  %v322_v18 = vperm.slane %v3800_v9, 1 }
  0xc6   :  { %1601 = vmatpush.bf16.msrb.mxu0 %v2802_v27  ;;  %v2991_v27 = vld [vmem:[#allocation9 + $0x438] sm:$0xf0]  ;;  %v1329_v43 = vadd.f32 %v1328_v17, %v321_v16 }
  0xc7   :  { %1615 = vmatpush.bf16.msrb.mxu1 %v2930_v30  ;;  %v1342_v30 = vpop.f32.mrf.mxu1 }
  0xc8   :  { %1629 = vmatpush.bf16.msrb.mxu2 %v3058_v31  ;;  %v3396_v31 = vld [vmem:[#allocation9 + $0x52c] sm:$0xf]  ;;  %v1343_v53 = vadd.f32 %v1342_v30, %v1329_v43 }
  0xc9   :  { %1643 = vmatpush.bf16.msrb.mxu3 %v3186_v37  ;;  %v2994_v37 = vor.u32 %v3364_v26, %v2991_v27  ;;  %v3122_v7 = vor.u32 %v3396_v31, %v3119_v32 }
  0xca   :  { %1602 = vmatpush.bf16.msrb.mxu0 %v2786_v44  ;;  %v2847_v44 = vld [vmem:[#allocation9 + $0x318] sm:$0xf0] }
  0xcb   :  { %1616 = vmatpush.bf16.msrb.mxu1 %v2914_v45  ;;  %v3360_v45 = vld [vmem:[#allocation9 + $0x40c] sm:$0xf]  ;;  %v1370_v62 = vpop.f32.mrf.mxu3 }
  0xcc   :  { %1630 = vmatpush.bf16.msrb.mxu2 %v3042_v8  ;;  %v2975_v8 = vld [vmem:[#allocation9 + $0x418] sm:$0xf0]  ;;  %v1356_v52 = vpop.f32.mrf.mxu2 }
  0xcd   :  { %1644 = vmatpush.bf16.msrb.mxu3 %v3170_v49  ;;  %v2850_v49 = vor.u32 %v3328_v42, %v2847_v44  ;;  %v2978_v51 = vor.u32 %v3360_v45, %v2975_v8  ;;  %v1330_v56 = vpop.f32.mrf.mxu0 }
  0xce   :  { %1603 = vmatpush.bf16.msrb.mxu0 %v2770_v57 }
  0xcf   :  { %1617 = vmatpush.bf16.msrb.mxu1 %v2898_v63  ;;  %v1344_v57 = vpop.f32.mrf.mxu1  ;;  %v1331_v63 = vadd.f32 %v1330_v56, %v321_v16 }
  0xd0   :  { %1631 = vmatpush.bf16.msrb.mxu2 %v3026_v0  ;;  %v1357_v0 = vadd.f32 %v1356_v52, %v1343_v53  ;;  %v323_v53 = vperm.slane %v3800_v9, 2 }
  0xd1   :  { %1645 = vmatpush.bf16.msrb.mxu3 %v3154_v4  ;;  %v1345_v1 = vadd.f32 %v1344_v57, %v1331_v63 }
  0xd2   :  { %1604 = vmatpush.bf16.msrb.mxu0 %v2754_v12  ;;  %v1371_v2 = vadd.f32 %v1370_v62, %v1357_v0 }
  0xd3   :  { %1618 = vmatpush.bf16.msrb.mxu1 %v2882_v14  ;;  %v1372_v11 = vpop.f32.mrf.mxu3 }
  0xd4   :  { %1632 = vmatpush.bf16.msrb.mxu2 %v3010_v15  ;;  %v1358_v3 = vpop.f32.mrf.mxu2 }
  0xd5   :  { %1646 = vmatpush.bf16.msrb.mxu3 %v3138_v20  ;;  %v1359_v10 = vadd.f32 %v1358_v3, %v1345_v1 }
  0xd6   :  { %1605 = vmatpush.bf16.msrb.mxu0 %v2738_v33 }
  0xd7   :  { %1619 = vmatpush.bf16.msrb.mxu1 %v2866_v36  ;;  %v1373_v13 = vadd.f32 %v1372_v11, %v1359_v10 }
  0xd8   :  { %1633 = vmatpush.bf16.msrb.mxu2 %v2994_v37 }
  0xd9   :  { %1647 = vmatpush.bf16.msrb.mxu3 %v3122_v7 }
  0xda   :  { %1606 = vmatpush.bf16.msrb.mxu0 %v2722_v48  ;;  %v1384_v4 = vpop.f32.mrf.mxu0 }
  0xdb   :  { %1620 = vmatpush.bf16.msrb.mxu1 %v2850_v49  ;;  %v1385_v5 = vadd.f32 %v1384_v4, %v1371_v2  ;;  %v1398_v6 = vpop.f32.mrf.mxu1 }
  0xdc   :  { %1634 = vmatpush.bf16.msrb.mxu2 %v2978_v51 }
  0xdd   :  { %1648 = vmatpush.bf16.msrb.mxu3 %v3106_v55  ;;  %1607 = vmatmul.bf16.vlgmr.msrb.gmra.mxu0 %v3757_v28  ;;  %v1399_v12 = vadd.f32 %v1398_v6, %v1385_v5 }
  0xde   :  { %1621 = vmatmul.bf16.vlgmr.msrb.gmra.mxu1 %v3761_v29 }
  0xdf   :  { %1635 = vmatmul.bf16.vlgmr.msrb.gmra.mxu2 %v3775_v50  ;;  %3440 = vtanh.f32 %v1399_v12 }
  0xe0   :  { %1649 = vmatmul.bf16.vlgmr.msrb.gmra.mxu3 %v3779_v54 }
  0xe2   :  { %v1386_v14 = vpop.f32.mrf.mxu0  ;;  %v1412_v50 = vpop.f32.mrf.mxu2 }
  0xe3   :  { %v1387_v15 = vadd.f32 %v1386_v14, %v1373_v13  ;;  %v1400_v28 = vpop.f32.mrf.mxu1  ;;  %v1426_v54 = vpop.f32.mrf.mxu3  ;;  %v1413_v19 = vadd.f32 %v1412_v50, %v322_v18 }
  0xe5   :  { %v3441_v16 = vpop.eup %3440  ;;  %v1401_v29 = vadd.f32 %v1400_v28, %v1387_v15  ;;  %v1427_v20 = vadd.f32 %v1426_v54, %v1413_v19 }
  0xe6   :  { %1695 = vmatpush.xpose.msra.mxu0 %v3441_v16 }
  0xe7   :  { %3442 = vtanh.f32 %v1401_v29  ;;  %v3809_v29 = vld [vmem:[#allocation11] sm:$0xf] }
  0xea   :  { %v1414_v25 = vpop.f32.mrf.mxu2 }
  0xeb   :  { %v1428_v26 = vpop.f32.mrf.mxu3  ;;  %v1415_v32 = vadd.f32 %v1414_v25, %v322_v18  ;;  %v1673_v25 = vperm.slane %v3809_v29, 1 }
  0xed   :  { %v3443_v17 = vpop.eup %3442  ;;  %v1429_v36 = vadd.f32 %v1428_v26, %v1415_v32  ;;  %v3814_v26 = vld [vmem:[#allocation6 + $0x8] sm:$0xff] }
  0xee   :  { %1775 = vmatpush.xpose.msrb.mxu0 %v3443_v17  ;;  %v1672_v17 = vperm.slane %v3809_v29, 0 }
  0xf0   :  { %1696 = vmatmul.f32.vlgmr.msra.gmra.mxu0 %v1672_v17 }
  0xf8   :  { %1776 = vmatmul.f32.vlgmr.msrb.gmra.mxu0 %v1672_v17 }
  0xfa   :  { %v1440_v27 = vpop.f32.mrf.mxu0 }
  0xfb   :  { %v1441_v30 = vadd.f32 %v1440_v27, %v1427_v20  ;;  %v1454_v31 = vpop.f32.mrf.mxu1  ;;  %v1674_v20 = vperm.slane %v3809_v29, 2  ;;  %v1866_v27 = vunpack.c.l.b16 %v3814_v26 }
  0xfd   :  { %v1455_v33 = vadd.f32 %v1454_v31, %v1441_v30  ;;  %v115_v30 = vld [vmem:[#allocation6] sm:$0xff]  ;;  %v1872_v32 = vpack.c.b16 %v1866_v27, %v1866_v27 }
  0xfe   :  { %v1864_v31 = vunpack.c.l.b16 %v115_v30 }
 0x102   :  { %v1468_v37 = vpop.f32.mrf.mxu2  ;;  %v1442_v39 = vpop.f32.mrf.mxu0 }
 0x103   :  { %v1469_v38 = vadd.f32 %v1468_v37, %v1455_v33  ;;  %v1482_v42 = vpop.f32.mrf.mxu3  ;;  %v1443_v43 = vadd.f32 %v1442_v39, %v1429_v36  ;;  %v1456_v44 = vpop.f32.mrf.mxu1  ;;  %v1865_v39 = vunpack.c.h.b16 %v115_v30 }
 0x105   :  { %v1483_v7 = vadd.f32 %v1482_v42, %v1469_v38  ;;  %v1457_v45 = vadd.f32 %v1456_v44, %v1443_v43  ;;  %v1870_v38 = vpack.c.b16 %v1864_v31, %v1864_v31  ;;  %v324_v42 = vperm.slane %v3800_v9, 3  ;;  %v3820_v44 = vld [vmem:[#allocation3] sm:$0xff] }
 0x106   :  { %v1871_v43 = vpack.c.b16 %v1865_v39, %v1865_v39  ;;  %v120_v39 = vld [vmem:[#allocation6 + $0x28] sm:$0xff] }
 0x107   :  { %3444 = vtanh.f32 %v1483_v7  ;;  %1889 = vmatpush.bf16.xpose.msra.mxu0 %v1870_v38  ;;  %v3818_v7 = vld [vmem:[#allocation3 + $0x8] sm:$0xff] }
 0x10a   :  { %v1470_v8 = vpop.f32.mrf.mxu2 }
 0x10b   :  { %v1471_v46 = vadd.f32 %v1470_v8, %v1457_v45  ;;  %v1484_v47 = vpop.f32.mrf.mxu3  ;;  %v1845_v45 = vunpack.c.l.b16 %v3818_v7  ;;  %v1843_v8 = vunpack.c.l.b16 %v3820_v44 }
 0x10d   :  { %v3445_v48 = vpop.eup %3444  ;;  %v1485_v49 = vadd.f32 %v1484_v47, %v1471_v46  ;;  %v1849_v47 = vpack.c.b16 %v1843_v8, %v1843_v8  ;;  %v1988_v8 = vunpack.c.l.b16 %v120_v39 }
 0x10e   :  { %1715 = vmatpush.xpose.msra.mxu1 %v3445_v48  ;;  %v1844_v48 = vunpack.c.h.b16 %v3820_v44 }
 0x10f   :  { %3446 = vtanh.f32 %v1485_v49  ;;  %v1851_v49 = vpack.c.b16 %v1845_v45, %v1845_v45  ;;  %1890 = vmatmul.bf16.vlgmr.msra.gmra.mxu0 %v1849_v47  ;;  %v1675_v45 = vperm.slane %v3809_v29, 3  ;;  %v1867_v47 = vunpack.c.h.b16 %v3814_v26 }
 0x111   :  { %1716 = vmatmul.f32.vlgmr.msra.gmra.mxu1 %v1673_v25 }
 0x115   :  { %v3447_v51 = vpop.eup %3446 }
 0x116   :  { %1795 = vmatpush.xpose.msrb.mxu1 %v3447_v51  ;;  %v1850_v51 = vpack.c.b16 %v1844_v48, %v1844_v48  ;;  %v1994_v48 = vpack.c.b16 %v1988_v8, %v1988_v8 }
 0x119   :  { %1796 = vmatmul.f32.vlgmr.msrb.gmra.mxu1 %v1673_v25 }
 0x11a   :  { %v1496_v52 = vpop.f32.mrf.mxu0  ;;  %1902 = vmatpush.bf16.xpose.msra.mxu1 %v1871_v43 }
 0x11b   :  { %v1510_v55 = vpop.f32.mrf.mxu1  ;;  %v1497_v56 = vadd.f32 %v1496_v52, %v323_v53  ;;  %v3659_v52 = vmov 0  }
 0x11c   :  { %3439 = vset.pattern.permute.xlu0 %v3659_v52  ;;  %v3837_v52 = vld [vmem:[#allocation3 + $0x20] sm:$0xff] }
 0x11d   :  { %v1511_v62 = vadd.f32 %v1510_v55, %v1497_v56  ;;  %v1965_v29 = vunpack.c.l.b16 %v3837_v52 }
 0x121   :  { %1903 = vmatmul.bf16.vlgmr.msra.gmra.mxu1 %v1850_v51 }
 0x122   :  { %v1524_v57 = vpop.f32.mrf.mxu2  ;;  %v1498_v63 = vpop.f32.mrf.mxu0 }
 0x123   :  { %v1512_v0 = vpop.f32.mrf.mxu1  ;;  %v1538_v1 = vpop.f32.mrf.mxu3  ;;  %v1499_v2 = vadd.f32 %v1498_v63, %v323_v53  ;;  %v1525_v3 = vadd.f32 %v1524_v57, %v1511_v62  ;;  %v1664_v53 = vld [vmem:[#allocation2] sm:$0x1]  ;;  %v3825_v62 = vld [vmem:[#allocation6 + $0x18] sm:$0xff] }
 0x124   :  { %1667 = vperm.xlu0 %3439, %v1664_v53   ;;  %v1985_v53 = vunpack.c.h.b16 %v3825_v62 }
 0x125   :  { %v1513_v4 = vadd.f32 %v1512_v0, %v1499_v2  ;;  %v1539_v5 = vadd.f32 %v1538_v1, %v1525_v3  ;;  %v1984_v0 = vunpack.c.l.b16 %v3825_v62  ;;  %v117_v2 = vld [vmem:[#allocation6 + $0x10] sm:$0xff]  ;;  %v1846_v62 = vunpack.c.h.b16 %v3818_v7 }
 0x12a   :  { %v1526_v6 = vpop.f32.mrf.mxu2 }
 0x12b   :  { %v1527_v13 = vadd.f32 %v1526_v6, %v1513_v4  ;;  %v1540_v14 = vpop.f32.mrf.mxu3  ;;  %v1868_v4 = vunpack.c.l.b16 %v117_v2 }
 0x12d   :  { %v1541_v28 = vadd.f32 %v1540_v14, %v1527_v13 }
 0x13a   :  { %v1552_v10 = vpop.f32.mrf.mxu0 }
 0x13b   :  { %v1553_v11 = vadd.f32 %v1552_v10, %v1539_v5  ;;  %v1566_v12 = vpop.f32.mrf.mxu1  ;;  %v1990_v5 = vpack.c.b16 %v1984_v0, %v1984_v0  ;;  %v1874_v10 = vpack.c.b16 %v1868_v4, %v1868_v4  ;;  %v1991_v0 = vpack.c.b16 %v1985_v53, %v1985_v53 }
 0x13c   :  { %v1989_v4 = vunpack.c.h.b16 %v120_v39 }
 0x13d   :  { %v1567_v15 = vadd.f32 %v1566_v12, %v1553_v11  ;;  %v1869_v11 = vunpack.c.h.b16 %v117_v2  ;;  %v3828_v12 = vld [vmem:[#allocation3 + $0x10] sm:$0xff]  ;;  %1941 = vmatpush.bf16.xpose.msrb.mxu0 %v1874_v10  ;;  %v1966_v2 = vunpack.c.h.b16 %v3837_v52 }
 0x13e   :  { %v1847_v14 = vunpack.c.l.b16 %v3828_v12  ;;  %v1995_v10 = vpack.c.b16 %v1989_v4, %v1989_v4 }
 0x13f   :  { %3448 = vtanh.f32 %v1567_v15  ;;  %v3831_v15 = vld [vmem:[#allocation3 + $0x18] sm:$0xff]  ;;  %v1875_v17 = vpack.c.b16 %v1869_v11, %v1869_v11 }
 0x140   :  { %v1963_v25 = vunpack.c.l.b16 %v3831_v15  ;;  %v1853_v27 = vpack.c.b16 %v1847_v14, %v1847_v14  ;;  %v1964_v11 = vunpack.c.h.b16 %v3831_v15 }
 0x141   :  { %1954 = vmatpush.bf16.xpose.msrb.mxu1 %v1875_v17 }
 0x142   :  { %v1554_v16 = vpop.f32.mrf.mxu0  ;;  %v1580_v33 = vpop.f32.mrf.mxu2 }
 0x143   :  { %v1555_v50 = vadd.f32 %v1554_v16, %v1541_v28  ;;  %v1568_v54 = vpop.f32.mrf.mxu1  ;;  %v1594_v37 = vpop.f32.mrf.mxu3  ;;  %v1581_v46 = vadd.f32 %v1580_v33, %v324_v42  ;;  %v1969_v33 = vpack.c.b16 %v1963_v25, %v1963_v25 }
 0x144   :  { %1942 = vmatmul.bf16.vlgmr.msrb.gmra.mxu0 %v1853_v27 }
 0x145   :  { %v3449_v18 = vpop.eup %3448  ;;  %v1569_v19 = vadd.f32 %v1568_v54, %v1555_v50  ;;  %v1595_v55 = vadd.f32 %v1594_v37, %v1581_v46  ;;  %v119_v46 = vld [vmem:[#allocation6 + $0x20] sm:$0xff] }
 0x146   :  { %1735 = vmatpush.xpose.msra.mxu2 %v3449_v18  ;;  %v1848_v18 = vunpack.c.h.b16 %v3828_v12  ;;  %v1987_v51 = vunpack.c.h.b16 %v119_v46 }
 0x147   :  { %3450 = vtanh.f32 %v1569_v19 }
 0x148   :  { %v1854_v31 = vpack.c.b16 %v1848_v18, %v1848_v18 }
 0x149   :  { %1736 = vmatmul.f32.vlgmr.msra.gmra.mxu2 %v1674_v20 }
 0x14a   :  { %v1582_v9 = vpop.f32.mrf.mxu2  ;;  %1955 = vmatmul.bf16.vlgmr.msrb.gmra.mxu1 %v1854_v31 }
 0x14b   :  { %v1596_v56 = vpop.f32.mrf.mxu3  ;;  %v1583_v3 = vadd.f32 %v1582_v9, %v324_v42 }
 0x14d   :  { %v3451_v36 = vpop.eup %3450  ;;  %v1597_v28 = vadd.f32 %v1596_v56, %v1583_v3  ;;  %v1873_v56 = vpack.c.b16 %v1867_v47, %v1867_v47 }
 0x14e   :  { %1815 = vmatpush.xpose.msrb.mxu2 %v3451_v36 }
 0x151   :  { %1816 = vmatmul.f32.vlgmr.msrb.gmra.mxu2 %v1674_v20 }
 0x152   :  { %1915 = vmatpush.bf16.xpose.msra.mxu2 %v1872_v32 }
 0x159   :  { %1916 = vmatmul.bf16.vlgmr.msra.gmra.mxu2 %v1851_v49  ;;  %v1986_v49 = vunpack.c.l.b16 %v119_v46 }
 0x15a   :  { %v1608_v57 = vpop.f32.mrf.mxu0  ;;  %2009 = vmatpush.bf16.xpose.msrb.mxu2 %v1990_v5  ;;  %v1972_v5 = vpack.c.b16 %v1966_v2, %v1966_v2 }
 0x15b   :  { %v1609_v63 = vadd.f32 %v1608_v57, %v1595_v55  ;;  %v1622_v1 = vpop.f32.mrf.mxu1  ;;  %v1992_v9 = vpack.c.b16 %v1986_v49, %v1986_v49  ;;  %v3840_v55 = vld [vmem:[#allocation3 + $0x28] sm:$0xff]  ;;  %v1993_v57 = vpack.c.b16 %v1987_v51, %v1987_v51 }
 0x15c   :  { %v1967_v26 = vunpack.c.l.b16 %v3840_v55  ;;  %v1968_v14 = vunpack.c.h.b16 %v3840_v55 }
 0x15d   :  { %v1623_v6 = vadd.f32 %v1622_v1, %v1609_v63  ;;  %2035 = vmatpush.bf16.xpose.msra.mxu0 %v1992_v9  ;;  %2048 = vmatpush.bf16.xpose.msra.mxu1 %v1993_v57  ;;  %v1971_v1 = vpack.c.b16 %v1965_v29, %v1965_v29 }
 0x15e   :  { %v1973_v3 = vpack.c.b16 %v1967_v26, %v1967_v26 }
 0x162   :  { %v1636_v13 = vpop.f32.mrf.mxu2  ;;  %v1610_v54 = vpop.f32.mrf.mxu0  ;;  %2061 = vmatpush.bf16.xpose.msra.mxu2 %v1994_v48 }
 0x163   :  { %v1637_v16 = vadd.f32 %v1636_v13, %v1623_v6  ;;  %v1650_v50 = vpop.f32.mrf.mxu3  ;;  %v1611_v20 = vadd.f32 %v1610_v54, %v1597_v28  ;;  %v1624_v30 = vpop.f32.mrf.mxu1  ;;  %v1852_v6 = vpack.c.b16 %v1846_v62, %v1846_v62  ;;  %v1970_v13 = vpack.c.b16 %v1964_v11, %v1964_v11 }
 0x164   :  { %2036 = vmatmul.bf16.vlgmr.msra.gmra.mxu0 %v1971_v1  ;;  %2049 = vmatmul.bf16.vlgmr.msra.gmra.mxu1 %v1972_v5  ;;  %v1974_v28 = vpack.c.b16 %v1968_v14, %v1968_v14 }
 0x165   :  { %v1651_v19 = vadd.f32 %v1650_v50, %v1637_v16  ;;  %v1625_v32 = vadd.f32 %v1624_v30, %v1611_v20 }
 0x167   :  { %3452 = vtanh.f32 %v1651_v19 }
 0x169   :  { %2010 = vmatmul.bf16.vlgmr.msrb.gmra.mxu2 %v1969_v33 }
 0x16a   :  { %v1638_v36 = vpop.f32.mrf.mxu2 }
 0x16b   :  { %v1639_v37 = vadd.f32 %v1638_v36, %v1625_v32  ;;  %v1652_v38 = vpop.f32.mrf.mxu3 }
 0x16d   :  { %v3453_v42 = vpop.eup %3452  ;;  %v1653_v43 = vadd.f32 %v1652_v38, %v1639_v37  ;;  %v1697_v16 = vpop.f32.mrf.mxu0 }
 0x16e   :  { %1755 = vmatpush.xpose.msra.mxu3 %v3453_v42 }
 0x16f   :  { %3454 = vtanh.f32 %v1653_v43 }
 0x171   :  { %1756 = vmatmul.f32.vlgmr.msra.gmra.mxu3 %v1675_v45 }
 0x175   :  { %v3455_v63 = vpop.eup %3454  ;;  %v1777_v17 = vpop.f32.mrf.mxu0 }
 0x176   :  { %1835 = vmatpush.xpose.msrb.mxu3 %v3455_v63 }
 0x179   :  { %1836 = vmatmul.f32.vlgmr.msrb.gmra.mxu3 %v1675_v45  ;;  %2062 = vmatmul.bf16.vlgmr.msra.gmra.mxu2 %v1973_v3 }
 0x17a   :  { %1928 = vmatpush.bf16.xpose.msra.mxu3 %v1873_v56 }
 0x181   :  { %1929 = vmatmul.bf16.vlgmr.msra.gmra.mxu3 %v1852_v6 }
 0x182   :  { %2022 = vmatpush.bf16.xpose.msrb.mxu3 %v1991_v0 }
 0x18a   :  { %2074 = vmatpush.bf16.xpose.msra.mxu3 %v1995_v10 }
 0x18c   :  { %v1891_v33 = vpop.f32.mrf.mxu0 }
 0x18e   :  { %v1717_v50 = vpop.f32.mrf.mxu1 }
 0x191   :  { %2023 = vmatmul.bf16.vlgmr.msrb.gmra.mxu3 %v1970_v13 }
 0x194   :  { %v1893_v39 = vpop.f32.mrf.mxu0 }
 0x196   :  { %v1668_v54 = vpop.permute.xlu0 %1667  ;;  %v1797_v25 = vpop.f32.mrf.mxu1 }
 0x197   :  { %v1670_v18 = vperm.slane %v1668_v54, 0 }
 0x199   :  { %v1698_v20 = vadd.f32 %v1697_v16, %v1670_v18  ;;  %v1778_v31 = vadd.f32 %v1777_v17, %v1670_v18 }
 0x19b   :  { %v1718_v27 = vadd.f32 %v1717_v50, %v1698_v20  ;;  %v1798_v32 = vadd.f32 %v1797_v25, %v1778_v31 }
 0x19e   :  { %v1904_v37 = vpop.f32.mrf.mxu1 }
 0x19f   :  { %v1905_v26 = vadd.f32 %v1904_v37, %v1891_v33 }
 0x1a1   :  { %2075 = vmatmul.bf16.vlgmr.msra.gmra.mxu3 %v1974_v28 }
 0x1a6   :  { %v1906_v43 = vpop.f32.mrf.mxu1 }
 0x1c1   :  { %v1943_v45 = vpop.f32.mrf.mxu0 }
 0x1c7   :  { %v1956_v46 = vpop.f32.mrf.mxu1 }
 0x1c9   :  { %v1945_v47 = vpop.f32.mrf.mxu0 }
 0x1cc   :  { %v1737_v19 = vpop.f32.mrf.mxu2 }
 0x1cd   :  { %v1738_v30 = vadd.f32 %v1737_v19, %v1718_v27 }
 0x1cf   :  { %v1958_v49 = vpop.f32.mrf.mxu1 }
 0x1d4   :  { %v1817_v36 = vpop.f32.mrf.mxu2 }
 0x1d5   :  { %v1818_v38 = vadd.f32 %v1817_v36, %v1798_v32 }
 0x1dc   :  { %v1917_v42 = vpop.f32.mrf.mxu2 }
 0x1dd   :  { %v1918_v62 = vadd.f32 %v1917_v42, %v1905_v26 }
 0x1e1   :  { %v2037_v53 = vpop.f32.mrf.mxu0  ;;  %v2050_v56 = vpop.f32.mrf.mxu1 }
 0x1e4   :  { %v1919_v8 = vpop.f32.mrf.mxu2 }
 0x1e9   :  { %v2039_v0 = vpop.f32.mrf.mxu0  ;;  %v2052_v2 = vpop.f32.mrf.mxu1 }
 0x1ec   :  { %v2011_v48 = vpop.f32.mrf.mxu2 }
 0x1f4   :  { %v1757_v9 = vpop.f32.mrf.mxu3  ;;  %v2013_v29 = vpop.f32.mrf.mxu2 }
 0x1f5   :  { %v3848_v51 = vadd.f32 %v1757_v9, %v1738_v30 }
 0x1fc   :  { %v1837_v57 = vpop.f32.mrf.mxu3  ;;  %v2063_v1 = vpop.f32.mrf.mxu2 }
 0x1fd   :  { %v3850_v63 = vadd.f32 %v1837_v57, %v1818_v38 }
 0x204   :  { %v1930_v3 = vpop.f32.mrf.mxu3  ;;  %v2065_v6 = vpop.f32.mrf.mxu2 }
 0x205   :  { %v1931_v4 = vadd.f32 %v1930_v3, %v1918_v62 }
 0x207   :  { %v1944_v5 = vadd.f32 %v1943_v45, %v1931_v4 }
 0x209   :  { %v1957_v10 = vadd.f32 %v1956_v46, %v1944_v5 }
 0x20b   :  { %v2080_v11 = vmul.f32 0.35355338, %v1957_v10 }
 0x20c   :  { %v1932_v13 = vpop.f32.mrf.mxu3 }
 0x20d   :  { %v2083_v14 = vsel %vm2082_vm0, %v2080_v11, -inf }
 0x20e   :  { %v2084_v28 = vrot.slane %v2083_v14, 4 }
 0x210   :  { %v2085_v16 = vmax.f32 %v2083_v14, %v2084_v28 }
 0x212   :  { %v2086_v50 = vrot.slane %v2085_v16, 2 }
 0x214   :  { %v2087_v54 = vmax.f32 %v2085_v16, %v2086_v50  ;;  %v2024_v17 = vpop.f32.mrf.mxu3 }
 0x215   :  { %v2025_v19 = vadd.f32 %v2024_v17, %v2011_v48 }
 0x216   :  { %v2088_v18 = vrot.slane %v2087_v54, 1 }
 0x217   :  { %v2038_v27 = vadd.f32 %v2037_v53, %v2025_v19 }
 0x218   :  { %v2089_v20 = vmax.f32 %v2087_v54, %v2088_v18  ;;  %v2137_v18 = vsub.f32 1.0, %v3848_v51 }
 0x219   :  { %v2051_v32 = vadd.f32 %v2050_v56, %v2038_v27 }
 0x21a   :  { %v2097_v25 = vsub.f32 %v2080_v11, %v2089_v20 }
 0x21b   :  { %v2064_v33 = vadd.f32 %v2063_v1, %v2051_v32 }
 0x21c   :  { %v2099_v30 = vmul.f32 1.442695, %v2097_v25  ;;  %v2026_v31 = vpop.f32.mrf.mxu3  ;;  %v2139_v25 = vperm.slane %v2137_v18, 0 }
 0x21e   :  { %3456 = vpow2.f32 %v2099_v30 }
 0x224   :  { %v3457_v36 = vpop.eup %3456  ;;  %v2076_v37 = vpop.f32.mrf.mxu3 }
 0x225   :  { %v2103_v38 = vsel %vm2082_vm0, %v3457_v36, 0.0  ;;  %v2077_v39 = vadd.f32 %v2076_v37, %v2064_v33 }
 0x226   :  { %v2104_v42 = vrot.slane %v2103_v38, 4 }
 0x227   :  { %v2081_v43 = vmul.f32 0.35355338, %v2077_v39 }
 0x228   :  { %v2105_v45 = vadd.f32 %v2104_v42, %v2103_v38 }
 0x229   :  { %v2090_v8 = vsel %vm2082_vm0, %v2081_v43, -inf }
 0x22a   :  { %v2106_v46 = vrot.slane %v2105_v45, 2  ;;  %v2091_v47 = vrot.slane %v2090_v8, 4 }
 0x22c   :  { %v2107_v48 = vadd.f32 %v2106_v46, %v2105_v45  ;;  %v2092_v49 = vmax.f32 %v2090_v8, %v2091_v47  ;;  %v2078_v9 = vpop.f32.mrf.mxu3 }
 0x22e   :  { %v2108_v53 = vrot.slane %v2107_v48, 1  ;;  %v2093_v29 = vrot.slane %v2092_v49, 2 }
 0x230   :  { %v2094_v57 = vmax.f32 %v2092_v49, %v2093_v29  ;;  %v2109_v56 = vadd.f32 %v2108_v53, %v2107_v48 }
 0x232   :  { %v2095_v26 = vrot.slane %v2094_v57, 1  ;;  %3458 = vrcp.f32 %v2109_v56 }
 0x234   :  { %v2096_v0 = vmax.f32 %v2094_v57, %v2095_v26 }
 0x236   :  { %v2098_v1 = vsub.f32 %v2081_v43, %v2096_v0 }
 0x238   :  { %v3459_v2 = vpop.eup %3458  ;;  %v2101_v62 = vmul.f32 1.442695, %v2098_v1 }
 0x239   :  { %v2119_v3 = vmul.f32 %v3459_v2, %v3457_v36 }
 0x23a   :  { %3460 = vpow2.f32 %v2101_v62 }
 0x23b   :  { %v2121_v4 = vsel %vm2082_vm0, %v2119_v3, 0.0  ;;  %v2141_v31 = vmul.f32 %v2139_v25, %v2119_v3  ;;  %v2293_v25 = vpack.c.b16 %v3731_v59, %v3731_v59 }
 0x23c   :  { %v2122_v5 = vrot.slane %v2121_v4, 4 }
 0x23e   :  { %v2123_v6 = vadd.f32 %v2122_v5, %v2121_v4 }
 0x240   :  { %v3461_v10 = vpop.eup %3460  ;;  %v2124_v11 = vrot.slane %v2123_v6, 2 }
 0x241   :  { %v2110_v13 = vsel %vm2082_vm0, %v3461_v10, 0.0 }
 0x242   :  { %v2111_v14 = vrot.slane %v2110_v13, 4  ;;  %v2125_v28 = vadd.f32 %v2124_v11, %v2123_v6 }
 0x244   :  { %v2112_v16 = vadd.f32 %v2111_v14, %v2110_v13  ;;  %v2126_v50 = vrot.slane %v2125_v28, 1  ;;  %v2187_v14 = vpack.c.b16 %v3729_v58, %v3729_v58  ;;  %v2191_v58 = vpack.c.b16 %v3765_v34, %v3765_v34 }
 0x246   :  { %v2113_v54 = vrot.slane %v2112_v16, 2  ;;  %v2127_v17 = vadd.f32 %v2126_v50, %v2125_v28  ;;  %v2188_v28 = vpack.c.b16 %v3733_v60, %v3733_v60  ;;  %v2190_v50 = vpack.c.b16 %v3751_v23, %v3751_v23 }
 0x247   :  { %v2192_v60 = vpack.c.b16 %v3769_v40, %v3769_v40 }
 0x248   :  { %v2114_v19 = vadd.f32 %v2113_v54, %v2112_v16  ;;  %v2135_v20 = vmul.f32 0.125, %v2127_v17  ;;  %v2189_v16 = vpack.c.b16 %v3747_v21, %v3747_v21  ;;  %v2198_v54 = vsel %vm2196_vm1, %v2187_v14, 0 }
 0x249   :  { %v2201_v17 = vsel %vm2196_vm1, %v2188_v28, 0  ;;  %2222 = vmatpush.bf16.msrb.mxu0 %v2198_v54  ;;  %v2210_v21 = vsel %vm2196_vm1, %v2191_v58, 0  ;;  %v2213_v23 = vsel %vm2196_vm1, %v2192_v60, 0 }
 0x24a   :  { %v2143_v27 = vmul.f32 %v2135_v20, %v3848_v51  ;;  %v2115_v30 = vrot.slane %v2114_v19, 1  ;;  %v2138_v51 = vsub.f32 1.0, %v3850_v63  ;;  %v2204_v18 = vsel %vm2196_vm1, %v2189_v16, 0  ;;  %2235 = vmatpush.bf16.msrb.mxu1 %v2201_v17 }
 0x24b   :  { %2248 = vmatpush.bf16.msrb.mxu2 %v2204_v18 }
 0x24c   :  { %v2145_v32 = vperm.slane %v2143_v27, 0  ;;  %v2116_v33 = vadd.f32 %v2115_v30, %v2114_v19  ;;  %v2140_v53 = vperm.slane %v2138_v51, 0  ;;  %v2207_v19 = vsel %vm2196_vm1, %v2190_v50, 0 }
 0x24d   :  { %2261 = vmatpush.bf16.msrb.mxu3 %v2207_v19  ;;  %2274 = vmatpush.bf16.msra.mxu0 %v2210_v21  ;;  %v2294_v27 = vpack.c.b16 %v3735_v61, %v3735_v61  ;;  %v2303_v30 = vsel %vm2196_vm1, %v2293_v25, 0  ;;  %v2177_v51 = vunpack.c.l.bf16 %v3818_v7  ;;  %v2185_v21 = vunpack.c.l.bf16 %v3840_v55 }
 0x24e   :  { %v2147_v36 = vadd.f32 %v2145_v32, %v2141_v31  ;;  %3462 = vrcp.f32 %v2116_v33  ;;  %2287 = vmatpush.bf16.msra.mxu1 %v2213_v23  ;;  %v2295_v31 = vpack.c.b16 %v3749_v22, %v3749_v22  ;;  %v2296_v32 = vpack.c.b16 %v3753_v24, %v3753_v24 }
 0x24f   :  { %v2306_v34 = vsel %vm2196_vm1, %v2294_v27, 0  ;;  %2327 = vmatpush.bf16.msra.mxu2 %v2303_v30  ;;  %v2298_v22 = vpack.c.b16 %v3771_v41, %v3771_v41 }
 0x250   :  { %v2149_v37 = vmul.f32 0.03608439, %v2147_v36  ;;  %v2309_v59 = vsel %vm2196_vm1, %v2295_v31, 0  ;;  %v2312_v61 = vsel %vm2196_vm1, %v2296_v32, 0 }
 0x251   :  { %2340 = vmatpush.bf16.msra.mxu3 %v2306_v34 }
 0x252   :  { %v2151_v38 = vsel %vm2082_vm0, %v2149_v37, -inf }
 0x253   :  { %2152 = vmax.xlane.f32.xlu0 %v2151_v38  ;;  %v2318_v38 = vsel %vm2196_vm1, %v2298_v22, 0 }
 0x254   :  { %v3463_v39 = vpop.eup %3462 }
 0x255   :  { %v2120_v42 = vmul.f32 %v3463_v39, %v3461_v10 }
 0x257   :  { %v2128_v43 = vsel %vm2082_vm0, %v2120_v42, 0.0  ;;  %v2142_v57 = vmul.f32 %v2140_v53, %v2120_v42 }
 0x258   :  { %v2129_v45 = vrot.slane %v2128_v43, 4 }
 0x25a   :  { %v2130_v8 = vadd.f32 %v2129_v45, %v2128_v43  ;;  %v2175_v43 = vunpack.c.l.bf16 %v3820_v44  ;;  %v2176_v45 = vunpack.c.h.bf16 %v3820_v44  ;;  %v2179_v44 = vunpack.c.l.bf16 %v3828_v12 }
 0x25c   :  { %v2131_v46 = vrot.slane %v2130_v8, 2 }
 0x25e   :  { %v2132_v47 = vadd.f32 %v2131_v46, %v2130_v8 }
 0x260   :  { %v2133_v48 = vrot.slane %v2132_v47, 1 }
 0x262   :  { %v2134_v49 = vadd.f32 %v2133_v48, %v2132_v47 }
 0x264   :  { %v2136_v9 = vmul.f32 0.125, %v2134_v49  ;;  %v2178_v49 = vunpack.c.h.bf16 %v3818_v7 }
 0x266   :  { %v2144_v29 = vmul.f32 %v2136_v9, %v3850_v63 }
 0x268   :  { %v2146_v56 = vperm.slane %v2144_v29, 0 }
 0x26a   :  { %v2148_v26 = vadd.f32 %v2146_v56, %v2142_v57 }
 0x26c   :  { %v2150_v0 = vmul.f32 0.03608439, %v2148_v26 }
 0x26e   :  { %v2154_v1 = vsel %vm2082_vm0, %v2150_v0, -inf }
 0x26f   :  { %2155 = vmax.xlane.f32.xlu1 %v2154_v1 }
 0x2c6   :  { %v2153_v2 = vpop.xlane.xlu0 %2152 }
 0x2c7   :  { %v2157_v62 = vsub.f32 %v2149_v37, %v2153_v2  ;;  %v2297_v37 = vpack.c.b16 %v3767_v35, %v3767_v35 }
 0x2c9   :  { %v2159_v3 = vmul.f32 1.442695, %v2157_v62  ;;  %v2315_v24 = vsel %vm2196_vm1, %v2297_v37, 0 }
 0x2cb   :  { %3464 = vpow2.f32 %v2159_v3 }
 0x2d1   :  { %v3465_v4 = vpop.eup %3464 }
 0x2d2   :  { %v2163_v5 = vsel %vm2082_vm0, %v3465_v4, 0.0 }
 0x2d3   :  { %2164 = vadd.xlane.f32.xlu1 %v2163_v5 }
 0x2e2   :  { %v2156_v6 = vpop.xlane.xlu1 %2155 }
 0x2e3   :  { %v2158_v10 = vsub.f32 %v2150_v0, %v2156_v6  ;;  %v2180_v0 = vunpack.c.h.bf16 %v3828_v12 }
 0x2e5   :  { %v2161_v11 = vmul.f32 1.442695, %v2158_v10  ;;  %v2183_v10 = vunpack.c.l.bf16 %v3837_v52 }
 0x2e7   :  { %3466 = vpow2.f32 %v2161_v11  ;;  %v2184_v11 = vunpack.c.h.bf16 %v3837_v52 }
 0x2ed   :  { %v3467_v63 = vpop.eup %3466 }
 0x2ee   :  { %v2166_v13 = vsel %vm2082_vm0, %v3467_v63, 0.0 }
 0x2ef   :  { %2167 = vadd.xlane.f32.xlu2 %v2166_v13  ;;  %v2182_v13 = vunpack.c.h.bf16 %v3831_v15 }
 0x346   :  { %v2165_v20 = vpop.xlane.xlu1 %2164 }
 0x347   :  { %3468 = vrcp.f32 %v2165_v20 }
 0x34d   :  { %v3469_v40 = vpop.eup %3468 }
 0x34e   :  { %v2171_v33 = vmul.f32 %v3469_v40, %v3465_v4 }
 0x350   :  { %v2173_v36 = vpack.c.bf16 %v2171_v33, %v2171_v33  ;;  %2410 = vst.msk [vmem:[#allocation13] sm:$0xff] %vm2082_vm0, %v2171_v33 }
 0x352   :  { %3219 = vmatmul.msk.bf16.vlgmr.msrb.gmra.mxu0 %vm2082_vm0, %v2173_v36  ;;  %3220 = vmatmul.msk.bf16.vlgmr.msrb.gmra.mxu1 %vm2082_vm0, %v2173_v36 }
 0x353   :  { %3221 = vmatmul.msk.bf16.vlgmr.msrb.gmra.mxu2 %vm2082_vm0, %v2173_v36  ;;  %3222 = vmatmul.msk.bf16.vlgmr.msrb.gmra.mxu3 %vm2082_vm0, %v2173_v36 }
 0x354   :  { %2353 = vmatpush.bf16.msrb.mxu0 %v2309_v59  ;;  %2366 = vmatpush.bf16.msrb.mxu1 %v2312_v61 }
 0x355   :  { %2379 = vmatpush.bf16.msrb.mxu2 %v2315_v24  ;;  %2392 = vmatpush.bf16.msrb.mxu3 %v2318_v38 }
 0x362   :  { %v2168_v39 = vpop.xlane.xlu2 %2167  ;;  %3223 = vmatmul.msk.bf16.vlgmr.msra.gmra.mxu0 %vm2082_vm0, %v2173_v36  ;;  %3224 = vmatmul.msk.bf16.vlgmr.msra.gmra.mxu1 %vm2082_vm0, %v2173_v36 }
 0x363   :  { %3470 = vrcp.f32 %v2168_v39 }
 0x369   :  { %v3471_v35 = vpop.eup %3470 }
 0x36a   :  { %v2172_v41 = vmul.f32 %v3471_v35, %v3467_v63  ;;  %v2181_v63 = vunpack.c.l.bf16 %v3831_v15  ;;  %v2186_v15 = vunpack.c.h.bf16 %v3840_v55 }
 0x36c   :  { %v2174_v42 = vpack.c.bf16 %v2172_v41, %v2172_v41  ;;  %2411 = vst.msk [vmem:[#allocation13 + $0x8] sm:$0xff] %vm2082_vm0, %v2172_v41 }
 0x36d   :  { %2437 = dma.vmem_to_hbm [thread:$0]  %s2430_s10, 256, %s2432_s13, [#allocation14], %s3661_s14, %s3661_s14, %s3662_s15  }
 0x36e   :  { %3225 = vmatmul.msk.bf16.vlgmr.msra.gmra.mxu2 %vm2082_vm0, %v2174_v42  ;;  %3226 = vmatmul.msk.bf16.vlgmr.msra.gmra.mxu3 %vm2082_vm0, %v2174_v42 }
 0x372   :  { %3227 = vmatmul.msk.bf16.vlgmr.msrb.gmra.mxu0 %vm2082_vm0, %v2174_v42  ;;  %3228 = vmatmul.msk.bf16.vlgmr.msrb.gmra.mxu1 %vm2082_vm0, %v2174_v42 }
 0x37e   :  { %3229 = vmatmul.msk.bf16.vlgmr.msrb.gmra.mxu2 %vm2082_vm0, %v2174_v42  ;;  %3230 = vmatmul.msk.bf16.vlgmr.msrb.gmra.mxu3 %vm2082_vm0, %v2174_v42 }
 0x3cf   :  { %v2224_v8 = vpop.f32.mrf.mxu0  ;;  %v2237_v46 = vpop.f32.mrf.mxu1 }
 0x3d0   :  { %v2225_v47 = vadd.f32 %v2224_v8, %v2175_v43  ;;  %v2238_v48 = vadd.f32 %v2237_v46, %v2176_v45 }
 0x3d2   :  { %2398 = vst [vmem:[#allocation12] sm:$0xff] %v2225_v47 }
 0x3d3   :  { %2399 = vst [vmem:[#allocation12 + $0x8] sm:$0xff] %v2238_v48 }
 0x3d6   :  { %v2250_v9 = vpop.f32.mrf.mxu2  ;;  %v2263_v53 = vpop.f32.mrf.mxu3 }
 0x3d7   :  { %v2251_v29 = vadd.f32 %v2250_v9, %v2177_v51  ;;  %v2264_v57 = vadd.f32 %v2263_v53, %v2178_v49  ;;  %v2226_v56 = vpop.f32.mrf.mxu0  ;;  %v2239_v26 = vpop.f32.mrf.mxu1 }
 0x3d9   :  { %2400 = vst [vmem:[#allocation12 + $0x10] sm:$0xff] %v2251_v29 }
 0x3da   :  { %2401 = vst [vmem:[#allocation12 + $0x18] sm:$0xff] %v2264_v57 }
 0x3de   :  { %v2252_v1 = vpop.f32.mrf.mxu2  ;;  %v2265_v2 = vpop.f32.mrf.mxu3 }
 0x3df   :  { %v2276_v62 = vpop.f32.mrf.mxu0  ;;  %v2289_v3 = vpop.f32.mrf.mxu1 }
 0x3e0   :  { %v2277_v4 = vadd.f32 %v2276_v62, %v2179_v44  ;;  %v2290_v5 = vadd.f32 %v2289_v3, %v2180_v0 }
 0x3e2   :  { %2402 = vst [vmem:[#allocation12 + $0x20] sm:$0xff] %v2277_v4 }
 0x3e3   :  { %2403 = vst [vmem:[#allocation12 + $0x28] sm:$0xff] %v2290_v5 }
 0x3e7   :  { %v2278_v7 = vpop.f32.mrf.mxu0  ;;  %v2291_v6 = vpop.f32.mrf.mxu1 }
 0x3ef   :  { %v2355_v14 = vpop.f32.mrf.mxu0  ;;  %v2368_v12 = vpop.f32.mrf.mxu1 }
 0x3f0   :  { %v2356_v28 = vadd.f32 %v2355_v14, %v2183_v10  ;;  %v2369_v16 = vadd.f32 %v2368_v12, %v2184_v11 }
 0x3f1   :  { %v2329_v50 = vpop.f32.mrf.mxu2  ;;  %v2342_v54 = vpop.f32.mrf.mxu3 }
 0x3f2   :  { %2406 = vst [vmem:[#allocation12 + $0x40] sm:$0xff] %v2356_v28  ;;  %v2330_v17 = vadd.f32 %v2329_v50, %v2181_v63  ;;  %v2343_v18 = vadd.f32 %v2342_v54, %v2182_v13 }
 0x3f3   :  { %2407 = vst [vmem:[#allocation12 + $0x48] sm:$0xff] %v2369_v16 }
 0x3f4   :  { %2404 = vst [vmem:[#allocation12 + $0x30] sm:$0xff] %v2330_v17 }
 0x3f5   :  { %2405 = vst [vmem:[#allocation12 + $0x38] sm:$0xff] %v2343_v18 }
 0x3f7   :  { %v2357_v19 = vpop.f32.mrf.mxu0  ;;  %v2370_v58 = vpop.f32.mrf.mxu1 }
 0x3f9   :  { %v2331_v60 = vpop.f32.mrf.mxu2  ;;  %v2344_v52 = vpop.f32.mrf.mxu3 }
 0x401   :  { %v2381_v23 = vpop.f32.mrf.mxu2  ;;  %v2394_v20 = vpop.f32.mrf.mxu3 }
 0x402   :  { %v2382_v25 = vadd.f32 %v2381_v23, %v2185_v21  ;;  %v2395_v27 = vadd.f32 %v2394_v20, %v2186_v15 }
 0x404   :  { %2408 = vst [vmem:[#allocation12 + $0x50] sm:$0xff] %v2382_v25 }
 0x405   :  { %2409 = vst [vmem:[#allocation12 + $0x58] sm:$0xff] %v2395_v27 }
 0x406   :  { %2424 = dma.vmem_to_hbm [thread:$0]  %s2417_s6, 1536, %s2419_s18, [#allocation5], %s3664_s19, %s3664_s19, %s3665_s20  }
 0x409   :  { %v2383_v30 = vpop.f32.mrf.mxu2  ;;  %v2396_v34 = vpop.f32.mrf.mxu3 }
 0x40a   :  { %3646 = dma.done.wait [#allocation5], 1536  }
 0x40b   :  { %3647 = vsyncadd [#allocation5], 4294965760 }
 0x40c   :  { %3648 = dma.done.wait [#allocation14], 256  }
 0x40d   :  { %3649 = vsyncadd [#allocation14], 4294967040 }
 0x40e   :  { %2446 = vsyncpa [#allocation4], 1 }
 0x40f   :  { %2447 = vsyncpa [#allocation7], 1 }
 0x410   :  { %2448 = vsyncpa [#allocation10], 1 }
 0x411   :  { %2449 = vsyncpa [#allocation5], 1 }
 0x412   :  { %2450 = vsyncpa [#allocation14], 1 }

</bundles_post_ra>
